<compile_context>
chip_gen: v6e
topology: v6e:2x2x1
jax: 0.10.0
libtpu: 0.0.40
codegen_flags: <defaults>
</compile_context>

<pallas_src>
import jax
import jax.numpy as jnp
from jax.experimental import pallas as pl
from jax.experimental.pallas import tpu as pltpu


def _round_up(x, m):
    return ((x + m - 1) // m) * m


def odefunc_kernel(t_ref, ye_ref, wa_ref, wb_ref, b1_ref, wt_ref, b2_ref,
                   out_ref):
    rows = ye_ref.shape[0]
    D = ye_ref.shape[1] // 2
    H = b1_ref.shape[1]

    t = t_ref[0, 0]
    ye = ye_ref[...]                                   # (tile_b, 2D) f32

    # Loop-invariant across grid steps but recomputed per tile: hoisting into
    # a scratch under pl.when(program_id == 0) would be unsafe with
    # dimension_semantics=("parallel",) (second TensorCore never runs step 0).
    bias_eff = b1_ref[...] + t * wt_ref[...]           # (1, H) f32

    # Fused matmul #1: [y | e] @ blockdiag(W1, W2^T) -> [h_pre | e @ W2^T]
    u = jnp.dot(ye.astype(jnp.bfloat16), wa_ref[...],
                preferred_element_type=jnp.float32)    # (tile_b, 2H) f32
    a = jnp.tanh(u[:, :H] + bias_eff)                  # f32 (EUP)
    g = u[:, H:] * (1.0 - a * a)                       # (e @ W2^T) * tanh'

    # Fused matmul #2: [a | g] @ blockdiag(W2, W1^T) -> [dy_pre | e_dzdx]
    ag = jnp.concatenate([a, g], axis=1).astype(jnp.bfloat16)   # (tile_b, 2H)
    v = jnp.dot(ag, wb_ref[...],
                preferred_element_type=jnp.float32)    # (tile_b, 2D) f32

    dy = v[:, :D] + b2_ref[...]                        # (tile_b, D)
    e_dzdx = v[:, D:]                                  # (tile_b, D)
    e = ye[:, D:]                                      # (tile_b, D)

    div = jnp.sum(e_dzdx * e, axis=1, keepdims=True)            # (tile_b, 1)
    # D is the true feature dim (the slice is never lane-padded), so the mean
    # divides by the correct value.
    sqj = jnp.mean(e_dzdx * e_dzdx, axis=1, keepdims=True)      # (tile_b, 1)

    # Lane-dense packed output slab: lanes [0, D) = dy, lane D = -div,
    # lane D+1 = sqjacnorm, remaining lanes zeroed (never read back).
    out_ref[:, :D] = dy
    out_ref[:, D:D + 1] = -div
    out_ref[:, D + 1:D + 2] = sqj
    pad_lanes = out_ref.shape[1] - (D + 2)
    if pad_lanes > 0:
        out_ref[:, D + 2:] = jnp.zeros((rows, pad_lanes), jnp.float32)


def pack_params(w1, b1, wt, w2, b2):
    """Build kernel params once: bf16 block-diagonal fused weights + f32 biases.

    w1:(D,H) b1:(1,H) wt:(1,H) w2:(H,D) b2:(1,D).
    Returns (Wa=(2D,2H) bf16, Wb=(2H,2D) bf16, b1, wt, b2).
    """
    D, H = w1.shape
    wa = jnp.zeros((2 * D, 2 * H), jnp.float32)
    wa = wa.at[:D, :H].set(w1).at[D:, H:].set(w2.T)      # blockdiag(W1, W2^T)
    wb = jnp.zeros((2 * H, 2 * D), jnp.float32)
    wb = wb.at[:H, :D].set(w2).at[H:, D:].set(w1.T)      # blockdiag(W2, W1^T)
    return (wa.astype(jnp.bfloat16), wb.astype(jnp.bfloat16),
            b1.astype(jnp.float32), wt.astype(jnp.float32),
            b2.astype(jnp.float32))


def odefunc_forward(t, y, e, packed_params, *, tile_b=8192):
    """Returns (dy, -divergence, sqjacnorm) with shapes (B,D), (B,1), (B,1)."""
    B, D = y.shape
    wa, wb, b1, wt, b2 = packed_params
    H = b1.shape[1]
    assert wa.shape == (2 * D, 2 * H) and wb.shape == (2 * H, 2 * D)

    out_lanes = _round_up(D + 2, 128)

    # Batch tiling: as big as possible (per-grid-step overhead dominates at
    # these tiny D/H), but keep >= 2 grid steps for large batches so the
    # "parallel" axis can shard across both TensorCores on v7x.
    tile_b = max(8, min(tile_b, _round_up(B, 8)))
    if B >= 4096 and _round_up(B, tile_b) // tile_b < 2:
        tile_b = _round_up((B + 1) // 2, 8)
    B_pad = _round_up(B, tile_b)

    ye = jnp.concatenate([y, e], axis=1).astype(jnp.float32)   # (B, 2D)
    if B_pad != B:
        ye = jnp.pad(ye, ((0, B_pad - B), (0, 0)))

    grid = (B_pad // tile_b,)
    t_arr = jnp.reshape(jnp.asarray(t, jnp.float32), (1, 1))

    const = lambda bs: pl.BlockSpec(bs, lambda i: (0, 0))

    cost = pl.CostEstimate(
        flops=16 * B_pad * D * H,                       # 2 fused block-diag matmuls
        transcendentals=B_pad * H,                      # tanh
        bytes_accessed=(4 * B_pad * (2 * D + out_lanes)        # [y|e] in, slab out
                        + 2 * 2 * (2 * D) * (2 * H)            # 2 bf16 fused weights
                        + 4 * (2 * H + D)),                    # f32 biases
    )

    out = pl.pallas_call(
        odefunc_kernel,
        out_shape=jax.ShapeDtypeStruct((B_pad, out_lanes), jnp.float32),
        grid_spec=pltpu.PrefetchScalarGridSpec(
            num_scalar_prefetch=0,
            grid=grid,
            in_specs=[
                pl.BlockSpec((1, 1), lambda i: (0, 0),
                             memory_space=pltpu.MemorySpace.SMEM),   # t
                pl.BlockSpec((tile_b, 2 * D), lambda i: (i, 0)),     # [y | e]
                const((2 * D, 2 * H)),                               # blockdiag(W1, W2^T)
                const((2 * H, 2 * D)),                               # blockdiag(W2, W1^T)
                const((1, H)),                                       # b1
                const((1, H)),                                       # wt
                const((1, D)),                                       # b2
            ],
            out_specs=pl.BlockSpec((tile_b, out_lanes), lambda i: (i, 0)),
        ),
        compiler_params=pltpu.CompilerParams(
            dimension_semantics=("parallel",),       # megacore on v7x
            vmem_limit_bytes=48 * 1024 * 1024,       # safe on v7x's 64 MiB VMEM
        ),
        cost_estimate=cost,
    )(t_arr, ye, wa, wb, b1, wt, b2)

    dy = out[:B, :D]
    neg_div = out[:B, D:D + 1]
    sqjac = out[:B, D + 1:D + 2]
    return dy, neg_div, sqjac


def odefunc_forward_ref(t, y, e, params_f32):
    """Pure-JAX reference using autodiff (mirrors ODEnet fwd + divergence_approx)."""
    w1, b1, wt, w2, b2 = params_f32

    def diffeq(yy):
        a = jnp.tanh(yy @ w1 + b1 + t * wt)
        return a @ w2 + b2

    dy, vjp_fn = jax.vjp(diffeq, y)
    (e_dzdx,) = vjp_fn(e)
    div = jnp.sum(e_dzdx * e, axis=1, keepdims=True)
    sqj = jnp.mean(e_dzdx ** 2, axis=1, keepdims=True)
    return dy, -div, sqj


if __name__ == "__main__":
    B, D, H = 256, 16, 32
    key = jax.random.PRNGKey(0)
    k_y, k_e, k_w1, k_b1, k_wt, k_w2, k_b2 = jax.random.split(key, 7)

    y = jax.random.normal(k_y, (B, D), dtype=jnp.float32)
    # _e is None + rademacher=False + div_samples=1 -> one gaussian sample
    e = jax.random.normal(k_e, (B, D), dtype=jnp.float32)

    w1 = 0.1 * jax.random.normal(k_w1, (D, H), dtype=jnp.float32)
    b1 = 0.1 * jax.random.normal(k_b1, (1, H), dtype=jnp.float32)
    wt = 0.1 * jax.random.normal(k_wt, (1, H), dtype=jnp.float32)
    w2 = 0.1 * jax.random.normal(k_w2, (H, D), dtype=jnp.float32)
    b2 = 0.1 * jax.random.normal(k_b2, (1, D), dtype=jnp.float32)
    t = jnp.float32(0.5)

    params = pack_params(w1, b1, wt, w2, b2)
    dy, neg_div, sqjac = odefunc_forward(t, y, e, params)
    jax.block_until_ready((dy, neg_div, sqjac))

    # Reference uses the same bf16-rounded weights in f32 and full autodiff;
    # residual mismatch comes only from bf16 activation casts at the MXU.
    w1_r = w1.astype(jnp.bfloat16).astype(jnp.float32)
    w2_r = w2.astype(jnp.bfloat16).astype(jnp.float32)
    dy_r, neg_div_r, sqjac_r = odefunc_forward_ref(t, y, e, (w1_r, b1, wt, w2_r, b2))

    assert jnp.allclose(dy, dy_r, atol=3e-2, rtol=3e-2)
    assert jnp.allclose(neg_div, neg_div_r, atol=3e-2, rtol=3e-2)
    assert jnp.allclose(sqjac, sqjac_r, atol=3e-2, rtol=3e-2)

    print("KERNEL_OK")
</pallas_src>

<mosaic_0001>
module attributes {stable_mosaic.version = 11 : i64} {
  func.func @odefunc_kernel(%arg0: i32, %arg1: memref<1x1xf32, #tpu.memory_space<smem>>, %arg2: memref<256x32xf32, #tpu.memory_space<vmem>>, %arg3: memref<32x64xbf16, #tpu.memory_space<vmem>>, %arg4: memref<64x32xbf16, #tpu.memory_space<vmem>>, %arg5: memref<1x32xf32, #tpu.memory_space<vmem>>, %arg6: memref<1x32xf32, #tpu.memory_space<vmem>>, %arg7: memref<1x16xf32, #tpu.memory_space<vmem>>, %arg8: memref<256x128xf32, #tpu.memory_space<vmem>>) attributes {dimension_semantics = [#tpu.dimension_semantics<parallel>], iteration_bounds = array<i64: 1>, scalar_prefetch = 0 : i64, scratch_operands = 0 : i64, tpu.core_type = #tpu.core_type<tc>, window_params = [{transform_indices = @transform_0, window_bounds = array<i64: 1, 1>}, {transform_indices = @transform_1, window_bounds = array<i64: 256, 32>}, {pipeline_mode = #tpu.pipeline_mode<synchronous>, transform_indices = @transform_2, window_bounds = array<i64: 32, 64>}, {pipeline_mode = #tpu.pipeline_mode<synchronous>, transform_indices = @transform_3, window_bounds = array<i64: 64, 32>}, {pipeline_mode = #tpu.pipeline_mode<synchronous>, transform_indices = @transform_4, window_bounds = array<i64: 1, 32>}, {pipeline_mode = #tpu.pipeline_mode<synchronous>, transform_indices = @transform_5, window_bounds = array<i64: 1, 32>}, {pipeline_mode = #tpu.pipeline_mode<synchronous>, transform_indices = @transform_6, window_bounds = array<i64: 1, 16>}, {transform_indices = @transform_7, window_bounds = array<i64: 256, 128>}]} {
    %c0 = arith.constant 0 : index
    %c0_0 = arith.constant 0 : index
    %0 = memref.load %arg1[%c0, %c0_0] : memref<1x1xf32, #tpu.memory_space<smem>>
    %c0_1 = arith.constant 0 : index
    %c0_2 = arith.constant 0 : index
    %1 = vector.load %arg2[%c0_1, %c0_2] : memref<256x32xf32, #tpu.memory_space<vmem>>, vector<256x32xf32>
    %c0_3 = arith.constant 0 : index
    %c0_4 = arith.constant 0 : index
    %2 = vector.load %arg5[%c0_3, %c0_4] : memref<1x32xf32, #tpu.memory_space<vmem>>, vector<1x32xf32>
    %c0_5 = arith.constant 0 : index
    %c0_6 = arith.constant 0 : index
    %3 = vector.load %arg6[%c0_5, %c0_6] : memref<1x32xf32, #tpu.memory_space<vmem>>, vector<1x32xf32>
    %4 = vector.broadcast %0 : f32 to vector<1x32xf32>
    %5 = arith.mulf %4, %3 : vector<1x32xf32>
    %6 = arith.addf %2, %5 : vector<1x32xf32>
    %7 = arith.truncf %1 : vector<256x32xf32> to vector<256x32xbf16>
    %c0_7 = arith.constant 0 : index
    %c0_8 = arith.constant 0 : index
    %8 = vector.load %arg3[%c0_7, %c0_8] : memref<32x64xbf16, #tpu.memory_space<vmem>>, vector<32x64xbf16>
    %cst = arith.constant dense<0.000000e+00> : vector<256x64xf32>
    %9 = tpu.matmul %7, %8, %cst {dimension_numbers = #tpu.dot_dimension_numbers<[1], [0], [0], [1], [0, 0, 1, 1], [], []>} : vector<256x32xbf16>, vector<32x64xbf16>, vector<256x64xf32> -> vector<256x64xf32>
    %10 = vector.extract_strided_slice %9 {offsets = [0, 0], sizes = [256, 32], strides = [1, 1]} : vector<256x64xf32> to vector<256x32xf32>
    %11 = vector.broadcast %6 : vector<1x32xf32> to vector<256x32xf32>
    %12 = arith.addf %10, %11 : vector<256x32xf32>
    %13 = math.tanh %12 : vector<256x32xf32>
    %14 = vector.extract_strided_slice %9 {offsets = [0, 32], sizes = [256, 32], strides = [1, 1]} : vector<256x64xf32> to vector<256x32xf32>
    %15 = arith.mulf %13, %13 : vector<256x32xf32>
    %cst_9 = arith.constant 1.000000e+00 : f32
    %16 = vector.broadcast %cst_9 : f32 to vector<256x32xf32>
    %17 = arith.subf %16, %15 : vector<256x32xf32>
    %18 = arith.mulf %14, %17 : vector<256x32xf32>
    %19 = tpu.concatenate %13, %18 in 1 : vector<256x32xf32>, vector<256x32xf32> -> vector<256x64xf32>
    %20 = arith.truncf %19 : vector<256x64xf32> to vector<256x64xbf16>
    %c0_10 = arith.constant 0 : index
    %c0_11 = arith.constant 0 : index
    %21 = vector.load %arg4[%c0_10, %c0_11] : memref<64x32xbf16, #tpu.memory_space<vmem>>, vector<64x32xbf16>
    %cst_12 = arith.constant dense<0.000000e+00> : vector<256x32xf32>
    %22 = tpu.matmul %20, %21, %cst_12 {dimension_numbers = #tpu.dot_dimension_numbers<[1], [0], [0], [1], [0, 0, 1, 1], [], []>} : vector<256x64xbf16>, vector<64x32xbf16>, vector<256x32xf32> -> vector<256x32xf32>
    %23 = vector.extract_strided_slice %22 {offsets = [0, 0], sizes = [256, 16], strides = [1, 1]} : vector<256x32xf32> to vector<256x16xf32>
    %c0_13 = arith.constant 0 : index
    %c0_14 = arith.constant 0 : index
    %24 = vector.load %arg7[%c0_13, %c0_14] : memref<1x16xf32, #tpu.memory_space<vmem>>, vector<1x16xf32>
    %25 = vector.broadcast %24 : vector<1x16xf32> to vector<256x16xf32>
    %26 = arith.addf %23, %25 : vector<256x16xf32>
    %27 = vector.extract_strided_slice %22 {offsets = [0, 16], sizes = [256, 16], strides = [1, 1]} : vector<256x32xf32> to vector<256x16xf32>
    %28 = vector.extract_strided_slice %1 {offsets = [0, 16], sizes = [256, 16], strides = [1, 1]} : vector<256x32xf32> to vector<256x16xf32>
    %29 = arith.mulf %27, %28 : vector<256x16xf32>
    %cst_15 = arith.constant dense<0.000000e+00> : vector<256xf32>
    %30 = vector.multi_reduction <add>, %29, %cst_15 [1] : vector<256x16xf32> to vector<256xf32>
    %31 = vector.shape_cast %30 : vector<256xf32> to vector<256x1xf32>
    %32 = arith.mulf %27, %27 : vector<256x16xf32>
    %cst_16 = arith.constant dense<0.000000e+00> : vector<256xf32>
    %33 = vector.multi_reduction <add>, %32, %cst_16 [1] : vector<256x16xf32> to vector<256xf32>
    %34 = vector.shape_cast %33 : vector<256xf32> to vector<256x1xf32>
    %cst_17 = arith.constant 1.600000e+01 : f32
    %35 = vector.broadcast %cst_17 : f32 to vector<256x1xf32>
    %36 = arith.divf %34, %35 : vector<256x1xf32>
    %c0_18 = arith.constant 0 : index
    %c0_19 = arith.constant 0 : index
    %37 = vector.load %arg8[%c0_18, %c0_19] : memref<256x128xf32, #tpu.memory_space<vmem>>, vector<256x16xf32>
    tpu.vector_store %arg8[%c0_18, %c0_19], %26 {strides = array<i32>} : memref<256x128xf32, #tpu.memory_space<vmem>>, vector<256x16xf32>,
    %cst_20 = arith.constant 0.000000e+00 : f32
    %38 = vector.broadcast %cst_20 : f32 to vector<256x1xf32>
    %39 = arith.subf %38, %31 : vector<256x1xf32>
    %c0_21 = arith.constant 0 : index
    %c16 = arith.constant 16 : index
    %40 = vector.load %arg8[%c0_21, %c16] : memref<256x128xf32, #tpu.memory_space<vmem>>, vector<256x1xf32>
    tpu.vector_store %arg8[%c0_21, %c16], %39 {strides = array<i32>} : memref<256x128xf32, #tpu.memory_space<vmem>>, vector<256x1xf32>,
    %c0_22 = arith.constant 0 : index
    %c17 = arith.constant 17 : index
    %41 = vector.load %arg8[%c0_22, %c17] : memref<256x128xf32, #tpu.memory_space<vmem>>, vector<256x1xf32>
    tpu.vector_store %arg8[%c0_22, %c17], %36 {strides = array<i32>} : memref<256x128xf32, #tpu.memory_space<vmem>>, vector<256x1xf32>,
    %cst_23 = arith.constant 0.000000e+00 : f32
    %42 = vector.broadcast %cst_23 : f32 to vector<256x110xf32>
    %c0_24 = arith.constant 0 : index
    %c18 = arith.constant 18 : index
    %43 = vector.load %arg8[%c0_24, %c18] : memref<256x128xf32, #tpu.memory_space<vmem>>, vector<256x110xf32>
    tpu.vector_store %arg8[%c0_24, %c18], %42 {strides = array<i32>} : memref<256x128xf32, #tpu.memory_space<vmem>>, vector<256x110xf32>,
    return
  }
  func.func @transform_0(%arg0: i32) -> (i32, i32) {
    %c0_i32 = arith.constant 0 : i32
    %c0_i32_0 = arith.constant 0 : i32
    %c0_i32_1 = arith.constant 0 : i32
    return %c0_i32, %c0_i32_0 : i32, i32
  }
  func.func @transform_1(%arg0: i32) -> (i32, i32) {
    %c0_i32 = arith.constant 0 : i32
    %c0_i32_0 = arith.constant 0 : i32
    return %arg0, %c0_i32 : i32, i32
  }
  func.func @transform_2(%arg0: i32) -> (i32, i32) {
    %c0_i32 = arith.constant 0 : i32
    %c0_i32_0 = arith.constant 0 : i32
    %c0_i32_1 = arith.constant 0 : i32
    return %c0_i32, %c0_i32_0 : i32, i32
  }
  func.func @transform_3(%arg0: i32) -> (i32, i32) {
    %c0_i32 = arith.constant 0 : i32
    %c0_i32_0 = arith.constant 0 : i32
    %c0_i32_1 = arith.constant 0 : i32
    return %c0_i32, %c0_i32_0 : i32, i32
  }
  func.func @transform_4(%arg0: i32) -> (i32, i32) {
    %c0_i32 = arith.constant 0 : i32
    %c0_i32_0 = arith.constant 0 : i32
    %c0_i32_1 = arith.constant 0 : i32
    return %c0_i32, %c0_i32_0 : i32, i32
  }
  func.func @transform_5(%arg0: i32) -> (i32, i32) {
    %c0_i32 = arith.constant 0 : i32
    %c0_i32_0 = arith.constant 0 : i32
    %c0_i32_1 = arith.constant 0 : i32
    return %c0_i32, %c0_i32_0 : i32, i32
  }
  func.func @transform_6(%arg0: i32) -> (i32, i32) {
    %c0_i32 = arith.constant 0 : i32
    %c0_i32_0 = arith.constant 0 : i32
    %c0_i32_1 = arith.constant 0 : i32
    return %c0_i32, %c0_i32_0 : i32, i32
  }
  func.func @transform_7(%arg0: i32) -> (i32, i32) {
    %c0_i32 = arith.constant 0 : i32
    %c0_i32_0 = arith.constant 0 : i32
    return %arg0, %c0_i32 : i32, i32
  }
}

</mosaic_0001>

<bundles_post_ra>
// kernel: tpu_custom_call.1
= control target key start
LH: loop header
LB: loop body
LE: loop exit
PB: predicated region body
PF: predicated region fallthrough
CT: control target
= control target key end

     0   :  { %vm99_vm0 = vcmask 261120   ;;  %s3065_s0 = inlined_call_operand.<no memory space> [shape: f32[1,1], index: 0, kind: input, shape index: {}]   ;;  %s3066_s1 = inlined_call_operand.vmem [shape: f32[256,32], index: 1, kind: input, shape index: {}]   ;;  %s3067_s2 = inlined_call_operand.vmem [shape: bf16[32,64], index: 2, kind: input, shape index: {}]   ;;  %s3068_s3 = inlined_call_operand.vmem [shape: bf16[64,32], index: 3, kind: input, shape index: {}]   ;;  %s3069_s4 = inlined_call_operand.vmem [shape: f32[1,32], index: 4, kind: input, shape index: {}]   ;;  %s3070_s5 = inlined_call_operand.vmem [shape: f32[1,32], index: 5, kind: input, shape index: {}]   ;;  %s3071_s6 = inlined_call_operand.vmem [shape: f32[1,16], index: 6, kind: input, shape index: {}]   ;;  %s3072_s7 = inlined_call_operand.hbm [shape: f32[256,128], index: 7, kind: output, shape index: {}]  }
   0x1   :  { %v1816_v0 = vld [vmem:[%s3067_s2 + $0x8] sm:$0xff]   ;;  %v1817_v1 = vld [vmem:[%s3067_s2] sm:$0xff]   ;;  %v1998_v5 = vld [vmem:[%s3066_s1 + $0x10] sm:$0xff] }
   0x2   :  { %1734 = vmatprep.subr.bf16.mxu0 %v1816_v0  ;;  %v1986_v2 = vld [vmem:[%s3066_s1] sm:$0xff]  ;;  %v1991_v3 = vld [vmem:[%s3066_s1 + $0x8] sm:$0xff]  ;;  %3097 = vst [vmem:[#allocation8_spill] sm:$0xff] %v1998_v5  ;;  %v2003_v6 = vld [vmem:[%s3066_s1 + $0x18] sm:$0xff] }
   0x3   :  { %3095 = vst [vmem:[#allocation6_spill] sm:$0xff] %v1986_v2  ;;  %3096 = vst [vmem:[#allocation7_spill] sm:$0xff] %v1991_v3  ;;  %1735 = vmatpush3.bf16.msra.mxu0 %v1816_v0  ;;  %v67_v4 = vpack.c.bf16 %v1991_v3, %v1986_v2  ;;  %v2008_v7 = vld [vmem:[%s3066_s1 + $0x20] sm:$0xff]  ;;  %v35_v8 = vld [vmem:[%s3066_s1 + $0x28] sm:$0xff]  ;;  %v68_v9 = vpack.c.bf16 %v2003_v6, %v1998_v5 }
   0x4   :  { %3098 = vst [vmem:[#allocation9_spill] sm:$0xff] %v2003_v6  ;;  %1736 = vmatprep.subr.bf16.mxu0 %v1817_v1  ;;  %3099 = vst [vmem:[#allocation10_spill] sm:$0xff] %v2008_v7  ;;  %v69_v10 = vpack.c.bf16 %v35_v8, %v2008_v7  ;;  %v2022_v11 = vld [vmem:[%s3066_s1 + $0x30] sm:$0xff]  ;;  %v2027_v12 = vld [vmem:[%s3066_s1 + $0x38] sm:$0xff] }
   0x5   :  { %1738 = vmatprep.mubr.msk.bf16.mxu0 %vm99_vm0, %v67_v4  ;;  %3100 = vst [vmem:[#allocation11_spill] sm:$0xff] %v2022_v11  ;;  %3101 = vst [vmem:[#allocation12_spill] sm:$0xff] %v2027_v12  ;;  %v38_v13 = vld [vmem:[%s3066_s1 + $0x40] sm:$0xff]  ;;  %v39_v14 = vld [vmem:[%s3066_s1 + $0x48] sm:$0xff]  ;;  %v70_v15 = vpack.c.bf16 %v2027_v12, %v2022_v11 }
   0x6   :  { %v71_v16 = vpack.c.bf16 %v39_v14, %v38_v13 }
   0x7   :  { %1737 = vmatpush3.bf16.msra.mxu0 %v1817_v1 }
   0xa   :  { %1739 = vmatmul.mubr.msk.bf16.vlgmr.msra.gmra.mxu0 %vm99_vm0, %v68_v9 }
   0xb   :  { %1742 = vmatprep.mubr.msk.bf16.mxu0 %vm99_vm0, %v69_v10 }
   0xc   :  { %13 = vsyncpa [#allocation4], 0  ;;  %v2042_v17 = vld [vmem:[%s3066_s1 + $0x50] sm:$0xff]  ;;  %v2047_v18 = vld [vmem:[%s3066_s1 + $0x58] sm:$0xff]  ;;  %v310_v51 = vlaneseq  ;;  %v64_v53 = vstv %s3065_s0  ;;  %vm683_vm1 = vcmask 523264   ;;  %vm1092_vm2 = vcmask 130048  }
   0xd   :  { %3102 = vst [vmem:[#allocation13_spill] sm:$0xff] %v2042_v17  ;;  %3103 = vst [vmem:[#allocation14_spill] sm:$0xff] %v2047_v18  ;;  %v42_v19 = vld [vmem:[%s3066_s1 + $0x60] sm:$0xff]  ;;  %v43_v20 = vld [vmem:[%s3066_s1 + $0x68] sm:$0xff]  ;;  %v72_v21 = vpack.c.bf16 %v2047_v18, %v2042_v17  ;;  %s1932_s10 = smov 112   ;;  %vm1542_vm3 = vcmask 138368  }
   0xe   :  { %v73_v22 = vpack.c.bf16 %v43_v20, %v42_v19  ;;  %v44_v23 = vld [vmem:[%s3066_s1 + $0x70] sm:$0xff]  ;;  %v45_v24 = vld [vmem:[%s3066_s1 + $0x78] sm:$0xff]  ;;  %v46_v25 = vld [vmem:[%s3066_s1 + $0x80] sm:$0xff]  ;;  %v311_v55 = vshrl.u32 %v310_v51, 7  ;;  %vm1575_vm4 = vcmask 146568   ;;  %vm1608_vm5 = vcmask 1047696  }
   0xf   :  { %v47_v26 = vld [vmem:[%s3066_s1 + $0x88] sm:$0xff]  ;;  %v74_v27 = vpack.c.bf16 %v45_v24, %v44_v23  ;;  %v48_v29 = vld [vmem:[%s3066_s1 + $0x90] sm:$0xff]  ;;  %v49_v30 = vld [vmem:[%s3066_s1 + $0x98] sm:$0xff] }
  0x10   :  { %v75_v28 = vpack.c.bf16 %v47_v26, %v46_v25  ;;  %v50_v31 = vld [vmem:[%s3066_s1 + $0xa0] sm:$0xff]  ;;  %v51_v32 = vld [vmem:[%s3066_s1 + $0xa8] sm:$0xff]  ;;  %v76_v33 = vpack.c.bf16 %v49_v30, %v48_v29  ;;  %v52_v35 = vld [vmem:[%s3066_s1 + $0xb0] sm:$0xff]  ;;  %v312_v58 = vsub.s32 0, %v311_v55 }
  0x11   :  { %v77_v34 = vpack.c.bf16 %v51_v32, %v50_v31  ;;  %v53_v36 = vld [vmem:[%s3066_s1 + $0xb8] sm:$0xff]  ;;  %v54_v37 = vld [vmem:[%s3066_s1 + $0xc0] sm:$0xff]  ;;  %v55_v38 = vld [vmem:[%s3066_s1 + $0xc8] sm:$0xff] }
  0x12   :  { %1743 = vmatmul.mubr.msk.bf16.gmra.mxu0 %vm99_vm0, %v70_v15  ;;  %v78_v39 = vpack.c.bf16 %v53_v36, %v52_v35  ;;  %v79_v40 = vpack.c.bf16 %v55_v38, %v54_v37  ;;  %v56_v41 = vld [vmem:[%s3066_s1 + $0xd0] sm:$0xff]  ;;  %v57_v42 = vld [vmem:[%s3066_s1 + $0xd8] sm:$0xff]  ;;  %v58_v43 = vld [vmem:[%s3066_s1 + $0xe0] sm:$0xff] }
  0x13   :  { %1746 = vmatprep.mubr.msk.bf16.mxu0 %vm99_vm0, %v71_v16  ;;  %v59_v44 = vld [vmem:[%s3066_s1 + $0xe8] sm:$0xff]  ;;  %v80_v45 = vpack.c.bf16 %v57_v42, %v56_v41  ;;  %v60_v47 = vld [vmem:[%s3066_s1 + $0xf0] sm:$0xff]  ;;  %v61_v48 = vld [vmem:[%s3066_s1 + $0xf8] sm:$0xff] }
  0x14   :  { %v81_v46 = vpack.c.bf16 %v59_v44, %v58_v43  ;;  %v82_v49 = vpack.c.bf16 %v61_v48, %v60_v47  ;;  %v1818_v50 = vld [vmem:[%s3068_s3 + $0x18] sm:$0xff]   ;;  %v63_v52 = vld [vmem:[%s3070_s5] sm:$0x1]  ;;  %v1819_v8 = vld [vmem:[%s3068_s3 + $0x10] sm:$0xff]  }
  0x15   :  { %1770 = vmatprep.subr.bf16.mxu1 %v1818_v50  ;;  %v65_v54 = vmul.f32 %v64_v53, %v63_v52  ;;  %v62_v56 = vld [vmem:[%s3069_s4] sm:$0x1]  ;;  %v1820_v15 = vld [vmem:[%s3068_s3 + $0x8] sm:$0xff]  }
  0x16   :  { %1771 = vmatpush3.bf16.msra.mxu1 %v1818_v50 }
  0x17   :  { %v66_v57 = vadd.f32 %v65_v54, %v62_v56  ;;  %1772 = vmatprep.subr.bf16.mxu1 %v1819_v8 }
  0x19   :  { %v2134_v59 = vrot.slane %v66_v57, %v312_v58 }
  0x1a   :  { %1747 = vmatmul.mubr.msk.bf16.gmra.mxu0 %vm99_vm0, %v72_v21  ;;  %1773 = vmatpush3.bf16.msra.mxu1 %v1819_v8 }
  0x1b   :  { %1750 = vmatprep.mubr.msk.bf16.mxu0 %vm99_vm0, %v73_v22  ;;  %1774 = vmatprep.subr.bf16.mxu1 %v1820_v15  ;;  %v1821_v22 = vld [vmem:[%s3068_s3] sm:$0xff]   ;;  %s1931_s3 = smov 32  }
  0x1e   :  { %1775 = vmatpush3.bf16.msra.mxu1 %v1820_v15 }
  0x1f   :  { %1776 = vmatprep.subr.bf16.mxu1 %v1821_v22 }
  0x22   :  { %1751 = vmatmul.mubr.msk.bf16.gmra.mxu0 %vm99_vm0, %v74_v27  ;;  %1777 = vmatpush3.bf16.msra.mxu1 %v1821_v22 }
  0x23   :  { %1754 = vmatprep.mubr.msk.bf16.mxu0 %vm99_vm0, %v75_v28 }
  0x2a   :  { %1755 = vmatmul.mubr.msk.bf16.gmra.mxu0 %vm99_vm0, %v76_v33 }
  0x2b   :  { %1758 = vmatprep.mubr.msk.bf16.mxu0 %vm99_vm0, %v77_v34 }
  0x32   :  { %1759 = vmatmul.mubr.msk.bf16.gmra.mxu0 %vm99_vm0, %v78_v39 }
  0x33   :  { %1762 = vmatprep.mubr.msk.bf16.mxu0 %vm99_vm0, %v79_v40 }
  0x3a   :  { %1763 = vmatmul.mubr.msk.bf16.gmra.mxu0 %vm99_vm0, %v80_v45 }
  0x3b   :  { %1766 = vmatprep.mubr.msk.bf16.mxu0 %vm99_vm0, %v81_v46 }
  0x42   :  { %1767 = vmatmul.mubr.msk.bf16.gmra.mxu0 %vm99_vm0, %v82_v49 }
  0xca   :  { %v2136_v60 = vpop.f32.mrf.mxu0 }
  0xcb   :  { %v317_v61 = vadd.f32 %v2136_v60, %v2134_v59 }
  0xcc   :  { %v2140_v62 = vpop.f32.mrf.mxu0 }
  0xcd   :  { %1822 = vtanh.f32 %v317_v61  ;;  %v315_v63 = vadd.f32 %v2134_v59, %v2140_v62 }
  0xce   :  { %v2144_v0 = vpop.f32.mrf.mxu0 }
  0xcf   :  { %1824 = vtanh.f32 %v315_v63  ;;  %v318_v1 = vadd.f32 %v2144_v0, %v2134_v59 }
  0xd0   :  { %v2148_v4 = vpop.f32.mrf.mxu0 }
  0xd1   :  { %1826 = vtanh.f32 %v318_v1  ;;  %v316_v9 = vadd.f32 %v2134_v59, %v2148_v4 }
  0xd2   :  { %v2155_v10 = vpop.f32.mrf.mxu0 }
  0xd3   :  { %1828 = vtanh.f32 %v316_v9  ;;  %v321_v13 = vadd.f32 %v2155_v10, %v2134_v59 }
  0xd4   :  { %v2159_v14 = vpop.f32.mrf.mxu0 }
  0xd5   :  { %v319_v16 = vadd.f32 %v2134_v59, %v2159_v14  ;;  %1830 = vtanh.f32 %v321_v13 }
  0xd6   :  { %v2166_v19 = vpop.f32.mrf.mxu0 }
  0xd7   :  { %1832 = vtanh.f32 %v319_v16  ;;  %v322_v20 = vadd.f32 %v2166_v19, %v2134_v59 }
  0xd8   :  { %v2170_v21 = vpop.f32.mrf.mxu0 }
  0xd9   :  { %v320_v23 = vadd.f32 %v2134_v59, %v2170_v21  ;;  %1834 = vtanh.f32 %v322_v20 }
  0xda   :  { %v2177_v24 = vpop.eup %1822  ;;  %v2179_v25 = vpop.f32.mrf.mxu0 }
  0xdb   :  { %1836 = vtanh.f32 %v320_v23  ;;  %v325_v26 = vadd.f32 %v2179_v25, %v2134_v59  ;;  %v381_v27 = vmul.f32 %v2177_v24, %v2177_v24 }
  0xdc   :  { %v2185_v28 = vpop.eup %1824  ;;  %v2187_v29 = vpop.f32.mrf.mxu0 }
  0xdd   :  { %1838 = vtanh.f32 %v325_v26  ;;  %v323_v30 = vadd.f32 %v2134_v59, %v2187_v29  ;;  %v413_v31 = vsub.f32 1.0, %v381_v27  ;;  %v379_v32 = vmul.f32 %v2185_v28, %v2185_v28 }
  0xde   :  { %v2193_v33 = vpop.eup %1826  ;;  %v2195_v34 = vpop.f32.mrf.mxu0 }
  0xdf   :  { %1840 = vtanh.f32 %v323_v30  ;;  %v326_v35 = vadd.f32 %v2195_v34, %v2134_v59  ;;  %479 = vrot.lane.b32.xlu1 %v413_v31, %s1931_s3  ;;  %v411_v36 = vsub.f32 1.0, %v379_v32  ;;  %v382_v37 = vmul.f32 %v2193_v33, %v2193_v33 }
  0xe0   :  { %v2202_v38 = vpop.eup %1828  ;;  %v2204_v39 = vpop.f32.mrf.mxu0 }
  0xe1   :  { %1842 = vtanh.f32 %v326_v35  ;;  %v324_v40 = vadd.f32 %v2134_v59, %v2204_v39  ;;  %475 = vrot.lane.b32.xlu0 %v411_v36, %s1931_s3  ;;  %v414_v41 = vsub.f32 1.0, %v382_v37  ;;  %v380_v42 = vmul.f32 %v2202_v38, %v2202_v38 }
  0xe2   :  { %v2211_v43 = vpop.f32.mrf.mxu0  ;;  %v2213_v44 = vpop.eup %1830 }
  0xe3   :  { %1844 = vtanh.f32 %v324_v40  ;;  %v329_v45 = vadd.f32 %v2211_v43, %v2134_v59  ;;  %481 = vrot.lane.b32.xlu1 %v414_v41, %s1931_s3  ;;  %v412_v46 = vsub.f32 1.0, %v380_v42  ;;  %v385_v52 = vmul.f32 %v2213_v44, %v2213_v44 }
  0xe4   :  { %v2218_v47 = vpop.eup %1832  ;;  %v2220_v48 = vpop.f32.mrf.mxu0 }
  0xe5   :  { %1846 = vtanh.f32 %v329_v45  ;;  %v327_v49 = vadd.f32 %v2134_v59, %v2220_v48  ;;  %477 = vrot.lane.b32.xlu0 %v412_v46, %s1931_s3  ;;  %v383_v50 = vmul.f32 %v2218_v47, %v2218_v47  ;;  %v417_v8 = vsub.f32 1.0, %v385_v52 }
  0xe6   :  { %v2227_v51 = vpop.f32.mrf.mxu0  ;;  %v2231_v53 = vpop.eup %1834 }
  0xe7   :  { %1848 = vtanh.f32 %v327_v49  ;;  %v330_v54 = vadd.f32 %v2227_v51, %v2134_v59  ;;  %v415_v55 = vsub.f32 1.0, %v383_v50  ;;  %v386_v15 = vmul.f32 %v2231_v53, %v2231_v53 }
  0xe8   :  { %v2235_v56 = vpop.eup %1836  ;;  %v2237_v57 = vpop.f32.mrf.mxu0 }
  0xe9   :  { %1850 = vtanh.f32 %v330_v54  ;;  %v328_v58 = vadd.f32 %v2134_v59, %v2237_v57  ;;  %483 = vrot.lane.b32.xlu0 %v415_v55, %s1931_s3  ;;  %v384_v61 = vmul.f32 %v2235_v56, %v2235_v56  ;;  %v418_v32 = vsub.f32 1.0, %v386_v15 }
  0xea   :  { %v2244_v63 = vpop.eup %1838  ;;  %v2246_v1 = vpop.f32.mrf.mxu0 }
  0xeb   :  { %1852 = vtanh.f32 %v328_v58  ;;  %v333_v9 = vadd.f32 %v2246_v1, %v2134_v59  ;;  %v416_v13 = vsub.f32 1.0, %v384_v61  ;;  %v389_v22 = vmul.f32 %v2244_v63, %v2244_v63 }
  0xec   :  { %v2252_v16 = vpop.eup %1840  ;;  %v2254_v20 = vpop.f32.mrf.mxu0 }
  0xed   :  { %1854 = vtanh.f32 %v333_v9  ;;  %v331_v23 = vadd.f32 %v2134_v59, %v2254_v20  ;;  %487 = vrot.lane.b32.xlu0 %v417_v8, %s1931_s3  ;;  %485 = vrot.lane.b32.xlu1 %v416_v13, %s1931_s3  ;;  %v387_v26 = vmul.f32 %v2252_v16, %v2252_v16  ;;  %v421_v40 = vsub.f32 1.0, %v389_v22 }
  0xee   :  { %v2264_v27 = vpop.eup %1842  ;;  %v2266_v30 = vpop.f32.mrf.mxu0 }
  0xef   :  { %1856 = vtanh.f32 %v331_v23  ;;  %v334_v31 = vadd.f32 %v2266_v30, %v2134_v59  ;;  %v419_v35 = vsub.f32 1.0, %v387_v26  ;;  %v390_v45 = vmul.f32 %v2264_v27, %v2264_v27 }
  0xf0   :  { %v2270_v36 = vpop.eup %1844  ;;  %v2272_v37 = vpop.f32.mrf.mxu0 }
  0xf1   :  { %1858 = vtanh.f32 %v334_v31  ;;  %v332_v41 = vadd.f32 %v2134_v59, %v2272_v37  ;;  %489 = vrot.lane.b32.xlu1 %v418_v32, %s1931_s3  ;;  %491 = vrot.lane.b32.xlu0 %v419_v35, %s1931_s3  ;;  %v388_v42 = vmul.f32 %v2270_v36, %v2270_v36  ;;  %v422_v8 = vsub.f32 1.0, %v390_v45 }
  0xf2   :  { %v2282_v46 = vpop.eup %1846  ;;  %v2284_v49 = vpop.f32.mrf.mxu0 }
  0xf3   :  { %1860 = vtanh.f32 %v332_v41  ;;  %v337_v50 = vadd.f32 %v2284_v49, %v2134_v59  ;;  %v420_v52 = vsub.f32 1.0, %v388_v42  ;;  %v393_v58 = vmul.f32 %v2282_v46, %v2282_v46 }
  0xf4   :  { %v2288_v54 = vpop.eup %1848  ;;  %v2290_v55 = vpop.f32.mrf.mxu0 }
  0xf5   :  { %1862 = vtanh.f32 %v337_v50  ;;  %v335_v61 = vadd.f32 %v2134_v59, %v2290_v55  ;;  %495 = vrot.lane.b32.xlu0 %v421_v40, %s1931_s3  ;;  %493 = vrot.lane.b32.xlu1 %v420_v52, %s1931_s3  ;;  %v391_v9 = vmul.f32 %v2288_v54, %v2288_v54  ;;  %v425_v32 = vsub.f32 1.0, %v393_v58 }
  0xf6   :  { %v2300_v13 = vpop.eup %1850  ;;  %v2302_v15 = vpop.f32.mrf.mxu0 }
  0xf7   :  { %1864 = vtanh.f32 %v335_v61  ;;  %v338_v22 = vadd.f32 %v2302_v15, %v2134_v59  ;;  %v423_v23 = vsub.f32 1.0, %v391_v9  ;;  %v394_v41 = vmul.f32 %v2300_v13, %v2300_v13 }
  0xf8   :  { %v2306_v26 = vpop.eup %1852  ;;  %v2308_v31 = vpop.f32.mrf.mxu0 }
  0xf9   :  { %1866 = vtanh.f32 %v338_v22  ;;  %v336_v35 = vadd.f32 %v2134_v59, %v2308_v31  ;;  %497 = vrot.lane.b32.xlu1 %v422_v8, %s1931_s3  ;;  %499 = vrot.lane.b32.xlu0 %v423_v23, %s1931_s3  ;;  %v392_v40 = vmul.f32 %v2306_v26, %v2306_v26  ;;  %v426_v22 = vsub.f32 1.0, %v394_v41 }
  0xfa   :  { %v2318_v42 = vpop.eup %1854  ;;  %v2320_v45 = vpop.f32.mrf.mxu0 }
  0xfb   :  { %3104 = vst [vmem:[#allocation15_spill] sm:$0xff] %v2320_v45  ;;  %1868 = vtanh.f32 %v336_v35  ;;  %v341_v50 = vadd.f32 %v2320_v45, %v2134_v59  ;;  %v424_v52 = vsub.f32 1.0, %v392_v40  ;;  %v397_v8 = vmul.f32 %v2318_v42, %v2318_v42 }
  0xfc   :  { %v2324_v58 = vpop.eup %1856  ;;  %v2326_v61 = vpop.f32.mrf.mxu0 }
  0xfd   :  { %1870 = vtanh.f32 %v341_v50  ;;  %v339_v9 = vadd.f32 %v2134_v59, %v2326_v61  ;;  %503 = vrot.lane.b32.xlu0 %v425_v32, %s1931_s3  ;;  %501 = vrot.lane.b32.xlu1 %v424_v52, %s1931_s3  ;;  %v395_v23 = vmul.f32 %v2324_v58, %v2324_v58  ;;  %v429_v32 = vsub.f32 1.0, %v397_v8 }
  0xfe   :  { %v2336_v35 = vpop.eup %1858  ;;  %v2338_v40 = vpop.f32.mrf.mxu0 }
  0xff   :  { %3105 = vst [vmem:[#allocation16_spill] sm:$0xff] %v2338_v40  ;;  %1872 = vtanh.f32 %v339_v9  ;;  %v342_v18 = vadd.f32 %v2338_v40, %v2134_v59  ;;  %v427_v50 = vsub.f32 1.0, %v395_v23  ;;  %v398_v9 = vmul.f32 %v2336_v35, %v2336_v35 }
 0x100   :  { %v2342_v17 = vpop.eup %1860  ;;  %v2344_v12 = vpop.f32.mrf.mxu0 }
 0x101   :  { %1874 = vtanh.f32 %v342_v18  ;;  %v340_v41 = vadd.f32 %v2134_v59, %v2344_v12  ;;  %505 = vrot.lane.b32.xlu1 %v426_v22, %s1931_s3  ;;  %507 = vrot.lane.b32.xlu0 %v427_v50, %s1931_s3  ;;  %v396_v52 = vmul.f32 %v2342_v17, %v2342_v17 }
 0x102   :  { %v2354_v23 = vpop.eup %1862  ;;  %v2356_v7 = vpop.f32.mrf.mxu0 }
 0x103   :  { %3106 = vst [vmem:[#allocation17_spill] sm:$0xff] %v2356_v7  ;;  %1876 = vtanh.f32 %v340_v41  ;;  %v345_v18 = vadd.f32 %v2356_v7, %v2134_v59  ;;  %v428_v8 = vsub.f32 1.0, %v396_v52  ;;  %v401_v50 = vmul.f32 %v2354_v23, %v2354_v23 }
 0x104   :  { %v2360_v3 = vpop.eup %1864  ;;  %v2362_v22 = vpop.f32.mrf.mxu0  ;;  %v430_v41 = vsub.f32 1.0, %v398_v9 }
 0x105   :  { %3107 = vst [vmem:[#allocation18_spill] sm:$0xff] %v2362_v22  ;;  %1878 = vtanh.f32 %v345_v18  ;;  %v343_v11 = vadd.f32 %v2134_v59, %v2362_v22  ;;  %511 = vrot.lane.b32.xlu0 %v429_v32, %s1931_s3  ;;  %509 = vrot.lane.b32.xlu1 %v428_v8, %s1931_s3  ;;  %v399_v6 = vmul.f32 %v2360_v3, %v2360_v3  ;;  %v433_v32 = vsub.f32 1.0, %v401_v50 }
 0x106   :  { %v2372_v52 = vpop.eup %1866  ;;  %v2374_v2 = vpop.f32.mrf.mxu0 }
 0x107   :  { %3108 = vst [vmem:[#allocation19_spill] sm:$0xff] %v2374_v2  ;;  %1880 = vtanh.f32 %v343_v11  ;;  %v346_v5 = vadd.f32 %v2374_v2, %v2134_v59  ;;  %v431_v18 = vsub.f32 1.0, %v399_v6  ;;  %v402_v8 = vmul.f32 %v2372_v52, %v2372_v52 }
 0x108   :  { %v2378_v7 = vpop.eup %1868  ;;  %v2380_v22 = vpop.f32.mrf.mxu0 }
 0x109   :  { %3109 = vst [vmem:[#allocation20_spill] sm:$0xff] %v2380_v22  ;;  %1882 = vtanh.f32 %v346_v5  ;;  %v344_v9 = vadd.f32 %v2134_v59, %v2380_v22  ;;  %513 = vrot.lane.b32.xlu1 %v430_v41, %s1931_s3  ;;  %515 = vrot.lane.b32.xlu0 %v431_v18, %s1931_s3  ;;  %v400_v11 = vmul.f32 %v2378_v7, %v2378_v7  ;;  %v434_v5 = vsub.f32 1.0, %v402_v8 }
 0x10a   :  { %v2390_v6 = vpop.eup %1870 }
 0x10b   :  { %3110 = vst [vmem:[#allocation21_spill] sm:$0xff] %v2390_v6  ;;  %1884 = vtanh.f32 %v344_v9  ;;  %v432_v2 = vsub.f32 1.0, %v400_v11  ;;  %v405_v50 = vmul.f32 %v2390_v6, %v2390_v6 }
 0x10c   :  { %v2392_v40 = vpop.eup %1872 }
 0x10d   :  { %519 = vrot.lane.b32.xlu0 %v433_v32, %s1931_s3  ;;  %517 = vrot.lane.b32.xlu1 %v432_v2, %s1931_s3  ;;  %v403_v59 = vmul.f32 %v2392_v40, %v2392_v40  ;;  %v437_v9 = vsub.f32 1.0, %v405_v50 }
 0x10e   :  { %v2400_v41 = vpop.eup %1874 }
 0x10f   :  { %3111 = vst [vmem:[#allocation22_spill] sm:$0xff] %v2400_v41  ;;  %v435_v18 = vsub.f32 1.0, %v403_v59  ;;  %v406_v32 = vmul.f32 %v2400_v41, %v2400_v41 }
 0x110   :  { %v2402_v22 = vpop.eup %1876 }
 0x111   :  { %3112 = vst [vmem:[#allocation23_spill] sm:$0xff] %v2402_v22  ;;  %521 = vrot.lane.b32.xlu1 %v434_v5, %s1931_s3  ;;  %523 = vrot.lane.b32.xlu0 %v435_v18, %s1931_s3  ;;  %v404_v2 = vmul.f32 %v2402_v22, %v2402_v22  ;;  %v438_v59 = vsub.f32 1.0, %v406_v32 }
 0x112   :  { %v2410_v11 = vpop.eup %1878 }
 0x113   :  { %3113 = vst [vmem:[#allocation24_spill] sm:$0xff] %v2410_v11  ;;  %v436_v8 = vsub.f32 1.0, %v404_v2  ;;  %v409_v50 = vmul.f32 %v2410_v11, %v2410_v11 }
 0x114   :  { %v2412_v6 = vpop.eup %1880 }
 0x115   :  { %3114 = vst [vmem:[#allocation25_spill] sm:$0xff] %v2412_v6  ;;  %527 = vrot.lane.b32.xlu0 %v437_v9, %s1931_s3  ;;  %525 = vrot.lane.b32.xlu1 %v436_v8, %s1931_s3  ;;  %v407_v5 = vmul.f32 %v2412_v6, %v2412_v6  ;;  %v441_v2 = vsub.f32 1.0, %v409_v50 }
 0x116   :  { %v2420_v18 = vpop.eup %1882 }
 0x117   :  { %3115 = vst [vmem:[#allocation26_spill] sm:$0xff] %v2420_v18  ;;  %v439_v22 = vsub.f32 1.0, %v407_v5  ;;  %v410_v32 = vmul.f32 %v2420_v18, %v2420_v18 }
 0x118   :  { %v2422_v41 = vpop.eup %1884 }
 0x119   :  { %3116 = vst [vmem:[#allocation27_spill] sm:$0xff] %v2422_v41  ;;  %529 = vrot.lane.b32.xlu1 %v438_v59, %s1931_s3  ;;  %531 = vrot.lane.b32.xlu0 %v439_v22, %s1931_s3  ;;  %v408_v9 = vmul.f32 %v2422_v41, %v2422_v41  ;;  %v442_v11 = vsub.f32 1.0, %v410_v32 }
 0x11b   :  { %v440_v8 = vsub.f32 1.0, %v408_v9 }
 0x11d   :  { %535 = vrot.lane.b32.xlu0 %v441_v2, %s1931_s3  ;;  %533 = vrot.lane.b32.xlu1 %v440_v8, %s1931_s3 }
 0x121   :  { %537 = vrot.lane.b32.xlu1 %v442_v11, %s1931_s3 }
 0x151   :  { %v480_v5 = vpop.permute.xlu1 %479 }
 0x152   :  { %v573_v41 = vmul.f32 %v2136_v60, %v480_v5 }
 0x153   :  { %v476_v6 = vpop.permute.xlu0 %475 }
 0x154   :  { %v571_v22 = vmul.f32 %v476_v6, %v2140_v62  ;;  %v605_v62 = vsel %vm99_vm0, %v2177_v24, %v573_v41 }
 0x155   :  { %v482_v59 = vpop.permute.xlu1 %481 }
 0x156   :  { %v574_v50 = vmul.f32 %v2144_v0, %v482_v59  ;;  %v603_v9 = vsel %vm99_vm0, %v2185_v28, %v571_v22 }
 0x157   :  { %v478_v45 = vpop.permute.xlu0 %477 }
 0x158   :  { %v572_v18 = vmul.f32 %v478_v45, %v2148_v4  ;;  %v606_v2 = vsel %vm99_vm0, %v2193_v33, %v574_v50 }
 0x159   :  { %v636_v32 = vpack.c.bf16 %v606_v2, %v605_v62 }
 0x15a   :  { %v604_v11 = vsel %vm99_vm0, %v2202_v38, %v572_v18 }
 0x15b   :  { %v484_v6 = vpop.permute.xlu0 %483  ;;  %v635_v0 = vpack.c.bf16 %v604_v11, %v603_v9 }
 0x15c   :  { %v575_v60 = vmul.f32 %v484_v6, %v2159_v14 }
 0x15d   :  { %1778 = vmatprep.mubr.msk.bf16.mxu1 %vm683_vm1, %v635_v0 }
 0x15e   :  { %1779 = vmatmul.mubr.msk.bf16.vlgmr.msra.gmra.mxu1 %vm683_vm1, %v636_v32  ;;  %v607_v38 = vsel %vm99_vm0, %v2218_v47, %v575_v60 }
 0x15f   :  { %v488_v4 = vpop.permute.xlu0 %487  ;;  %v486_v33 = vpop.permute.xlu1 %485 }
 0x160   :  { %v576_v28 = vmul.f32 %v486_v33, %v2170_v21  ;;  %v577_v45 = vmul.f32 %v2155_v10, %v488_v4 }
 0x162   :  { %v608_v24 = vsel %vm99_vm0, %v2235_v56, %v576_v28  ;;  %v609_v14 = vsel %vm99_vm0, %v2213_v44, %v577_v45 }
 0x163   :  { %v637_v41 = vpack.c.bf16 %v608_v24, %v607_v38  ;;  %v490_v18 = vpop.permute.xlu1 %489  ;;  %v492_v8 = vpop.permute.xlu0 %491 }
 0x164   :  { %v578_v5 = vmul.f32 %v2166_v19, %v490_v18  ;;  %v579_v47 = vmul.f32 %v492_v8, %v2187_v29 }
 0x165   :  { %1782 = vmatprep.mubr.msk.bf16.mxu1 %vm683_vm1, %v637_v41 }
 0x166   :  { %v610_v21 = vsel %vm99_vm0, %v2231_v53, %v578_v5  ;;  %v611_v19 = vsel %vm99_vm0, %v2252_v16, %v579_v47 }
 0x167   :  { %v638_v59 = vpack.c.bf16 %v610_v21, %v609_v14  ;;  %v496_v10 = vpop.permute.xlu0 %495  ;;  %v494_v22 = vpop.permute.xlu1 %493 }
 0x168   :  { %v580_v56 = vmul.f32 %v494_v22, %v2204_v39  ;;  %v581_v50 = vmul.f32 %v2179_v25, %v496_v10  ;;  %v3117_v22 = vld [vmem:[#allocation15_spill] sm:$0xff] }
 0x169   :  { %1783 = vmatmul.mubr.msk.bf16.gmra.mxu1 %vm683_vm1, %v638_v59 }
 0x16a   :  { %v612_v44 = vsel %vm99_vm0, %v2270_v36, %v580_v56  ;;  %v613_v39 = vsel %vm99_vm0, %v2244_v63, %v581_v50 }
 0x16b   :  { %v639_v2 = vpack.c.bf16 %v612_v44, %v611_v19  ;;  %v498_v9 = vpop.permute.xlu1 %497  ;;  %v500_v53 = vpop.permute.xlu0 %499  ;;  %v3118_v19 = vld [vmem:[#allocation23_spill] sm:$0xff] }
 0x16c   :  { %v582_v29 = vmul.f32 %v2195_v34, %v498_v9  ;;  %v583_v16 = vmul.f32 %v500_v53, %v2220_v48  ;;  %v3120_v9 = vld [vmem:[#allocation21_spill] sm:$0xff]  ;;  %v3121_v53 = vld [vmem:[#allocation22_spill] sm:$0xff] }
 0x16d   :  { %1786 = vmatprep.mubr.msk.bf16.mxu1 %vm683_vm1, %v639_v2  ;;  %v3119_v2 = vld [vmem:[#allocation16_spill] sm:$0xff] }
 0x16e   :  { %v614_v11 = vsel %vm99_vm0, %v2264_v27, %v582_v29  ;;  %v615_v34 = vsel %vm99_vm0, %v2288_v54, %v583_v16 }
 0x16f   :  { %v640_v62 = vpack.c.bf16 %v614_v11, %v613_v39  ;;  %v504_v25 = vpop.permute.xlu0 %503  ;;  %v502_v6 = vpop.permute.xlu1 %501  ;;  %v3122_v39 = vld [vmem:[#allocation18_spill] sm:$0xff] }
 0x170   :  { %v584_v36 = vmul.f32 %v502_v6, %v2237_v57  ;;  %v585_v0 = vmul.f32 %v2211_v43, %v504_v25  ;;  %v3123_v25 = vld [vmem:[#allocation20_spill] sm:$0xff] }
 0x171   :  { %1787 = vmatmul.mubr.msk.bf16.gmra.mxu1 %vm683_vm1, %v640_v62 }
 0x172   :  { %v616_v63 = vsel %vm99_vm0, %v2306_v26, %v584_v36  ;;  %v617_v57 = vsel %vm99_vm0, %v2282_v46, %v585_v0  ;;  %v3124_v36 = vld [vmem:[#allocation25_spill] sm:$0xff] }
 0x173   :  { %v641_v32 = vpack.c.bf16 %v616_v63, %v615_v34  ;;  %v506_v60 = vpop.permute.xlu1 %505  ;;  %v508_v27 = vpop.permute.xlu0 %507  ;;  %v3125_v0 = vld [vmem:[#allocation17_spill] sm:$0xff] }
 0x174   :  { %v586_v48 = vmul.f32 %v2227_v51, %v506_v60  ;;  %v587_v54 = vmul.f32 %v508_v27, %v2254_v20 }
 0x175   :  { %1790 = vmatprep.mubr.msk.bf16.mxu1 %vm683_vm1, %v641_v32  ;;  %v3126_v32 = vld [vmem:[#allocation27_spill] sm:$0xff] }
 0x176   :  { %v618_v4 = vsel %vm99_vm0, %v2300_v13, %v586_v48  ;;  %v619_v51 = vsel %vm99_vm0, %v2324_v58, %v587_v54  ;;  %v3128_v54 = vld [vmem:[#allocation24_spill] sm:$0xff] }
 0x177   :  { %v642_v33 = vpack.c.bf16 %v618_v4, %v617_v57  ;;  %v512_v43 = vpop.permute.xlu0 %511  ;;  %v510_v28 = vpop.permute.xlu1 %509  ;;  %v3127_v57 = vld [vmem:[#allocation19_spill] sm:$0xff] }
 0x178   :  { %v588_v26 = vmul.f32 %v510_v28, %v2272_v37  ;;  %v589_v38 = vmul.f32 %v2246_v1, %v512_v43  ;;  %v3129_v43 = vld [vmem:[#allocation26_spill] sm:$0xff] }
 0x179   :  { %1791 = vmatmul.mubr.msk.bf16.gmra.mxu1 %vm683_vm1, %v642_v33 }
 0x17a   :  { %v620_v46 = vsel %vm99_vm0, %v2342_v17, %v588_v26  ;;  %v621_v37 = vsel %vm99_vm0, %v2318_v42, %v589_v38 }
 0x17b   :  { %v643_v45 = vpack.c.bf16 %v620_v46, %v619_v51  ;;  %v514_v24 = vpop.permute.xlu1 %513  ;;  %v516_v13 = vpop.permute.xlu0 %515  ;;  %v2548_v51 = vld [vmem:[%s3071_s6] ss:$0 sm:$0xff] }
 0x17c   :  { %v590_v20 = vmul.f32 %v2266_v30, %v514_v24  ;;  %v591_v58 = vmul.f32 %v516_v13, %v2290_v55 }
 0x17d   :  { %1794 = vmatprep.mubr.msk.bf16.mxu1 %vm683_vm1, %v643_v45  ;;  %v3130_v45 = vld [vmem:[#allocation8_spill] sm:$0xff] }
 0x17e   :  { %v622_v41 = vsel %vm99_vm0, %v2336_v35, %v590_v20  ;;  %v623_v30 = vsel %vm99_vm0, %v2360_v3, %v591_v58  ;;  %v3131_v58 = vld [vmem:[#allocation6_spill] sm:$0xff] }
 0x17f   :  { %v644_v18 = vpack.c.bf16 %v622_v41, %v621_v37  ;;  %v520_v1 = vpop.permute.xlu0 %519  ;;  %v518_v8 = vpop.permute.xlu1 %517 }
 0x180   :  { %v592_v17 = vmul.f32 %v518_v8, %v2308_v31  ;;  %v593_v5 = vmul.f32 %v2284_v49, %v520_v1 }
 0x181   :  { %1795 = vmatmul.mubr.msk.bf16.gmra.mxu1 %vm683_vm1, %v644_v18 }
 0x182   :  { %v624_v42 = vsel %vm99_vm0, %v2378_v7, %v592_v17  ;;  %v625_v31 = vsel %vm99_vm0, %v2354_v23, %v593_v5  ;;  %v3132_v5 = vld [vmem:[#allocation9_spill] sm:$0xff] }
 0x183   :  { %v645_v14 = vpack.c.bf16 %v624_v42, %v623_v30  ;;  %v522_v21 = vpop.permute.xlu1 %521  ;;  %v524_v35 = vpop.permute.xlu0 %523 }
 0x184   :  { %v594_v55 = vmul.f32 %v2302_v15, %v522_v21  ;;  %v595_v3 = vmul.f32 %v524_v35, %v2326_v61 }
 0x185   :  { %1798 = vmatprep.mubr.msk.bf16.mxu1 %vm683_vm1, %v645_v14 }
 0x186   :  { %v626_v47 = vsel %vm99_vm0, %v2372_v52, %v594_v55  ;;  %v627_v15 = vsel %vm99_vm0, %v2392_v40, %v595_v3  ;;  %v3133_v55 = vld [vmem:[#allocation11_spill] sm:$0xff] }
 0x187   :  { %v646_v59 = vpack.c.bf16 %v626_v47, %v625_v31  ;;  %v528_v49 = vpop.permute.xlu0 %527  ;;  %v526_v10 = vpop.permute.xlu1 %525 }
 0x188   :  { %v596_v7 = vmul.f32 %v526_v10, %v2344_v12  ;;  %v597_v56 = vmul.f32 %v3117_v22, %v528_v49 }
 0x189   :  { %1799 = vmatmul.mubr.msk.bf16.gmra.mxu1 %vm683_vm1, %v646_v59 }
 0x18a   :  { %v628_v23 = vsel %vm99_vm0, %v3118_v19, %v596_v7  ;;  %v629_v12 = vsel %vm99_vm0, %v3120_v9, %v597_v56  ;;  %v3134_v7 = vld [vmem:[#allocation7_spill] sm:$0xff] }
 0x18b   :  { %v647_v50 = vpack.c.bf16 %v628_v23, %v627_v15  ;;  %v530_v44 = vpop.permute.xlu1 %529  ;;  %v532_v52 = vpop.permute.xlu0 %531 }
 0x18c   :  { %v598_v61 = vmul.f32 %v3119_v2, %v530_v44  ;;  %v599_v40 = vmul.f32 %v532_v52, %v3122_v39  ;;  %v3135_v44 = vld [vmem:[#allocation10_spill] sm:$0xff]  ;;  %v3136_v2 = vld [vmem:[#allocation12_spill] sm:$0xff] }
 0x18d   :  { %1802 = vmatprep.mubr.msk.bf16.mxu1 %vm683_vm1, %v647_v50 }
 0x18e   :  { %v630_v29 = vsel %vm99_vm0, %v3121_v53, %v598_v61  ;;  %v631_v34 = vsel %vm99_vm0, %v3124_v36, %v599_v40 }
 0x18f   :  { %v648_v11 = vpack.c.bf16 %v630_v29, %v629_v12  ;;  %v536_v16 = vpop.permute.xlu0 %535  ;;  %v534_v62 = vpop.permute.xlu1 %533 }
 0x190   :  { %v600_v6 = vmul.f32 %v534_v62, %v3123_v25  ;;  %v601_v63 = vmul.f32 %v3125_v0, %v536_v16 }
 0x191   :  { %1803 = vmatmul.mubr.msk.bf16.gmra.mxu1 %vm683_vm1, %v648_v11 }
 0x192   :  { %v632_v60 = vsel %vm99_vm0, %v3126_v32, %v600_v6  ;;  %v633_v33 = vsel %vm99_vm0, %v3128_v54, %v601_v63  ;;  %v1886_v6 = vld [vmem:[%s3066_s1 + $0x28] sm:$0xff] }
 0x193   :  { %v649_v27 = vpack.c.bf16 %v632_v60, %v631_v34  ;;  %v538_v48 = vpop.permute.xlu1 %537  ;;  %v3137_v34 = vld [vmem:[#allocation13_spill] sm:$0xff] }
 0x194   :  { %v602_v4 = vmul.f32 %v3127_v57, %v538_v48 }
 0x195   :  { %1806 = vmatprep.mubr.msk.bf16.mxu1 %vm683_vm1, %v649_v27 }
 0x196   :  { %v634_v28 = vsel %vm99_vm0, %v3129_v43, %v602_v4 }
 0x197   :  { %v650_v26 = vpack.c.bf16 %v634_v28, %v633_v33  ;;  %v1887_v28 = vld [vmem:[%s3066_s1 + $0x40] sm:$0xff] }
 0x199   :  { %1807 = vmatmul.mubr.msk.bf16.gmra.mxu1 %vm683_vm1, %v650_v26 }
 0x21e   :  { %v1780_v38 = vpop.f32.mrf.mxu1 }
 0x21f   :  { %v902_v46 = vadd.f32 %v1780_v38, %v2548_v51  ;;  %v934_v24 = vmul.f32 %v1780_v38, %v3130_v45  ;;  %v1191_v13 = vmul.f32 %v1780_v38, %v1780_v38  ;;  %v3138_v38 = vld [vmem:[#allocation14_spill] sm:$0xff] }
 0x220   :  { %v766_v20 = vpop.f32.mrf.mxu1 }
 0x221   :  { %1480 = vst.msk [vmem:[#allocation3 + $0x10] sm:$0xff] %vm1092_vm2, %v902_v46  ;;  %v900_v37 = vadd.f32 %v2548_v51, %v766_v20  ;;  %1000 = vrot.lane.b32.xlu0 %v934_v24, %s1932_s10  ;;  %1257 = vrot.lane.b32.xlu1 %v1191_v13, %s1932_s10  ;;  %v932_v18 = vmul.f32 %v766_v20, %v3131_v58 }
 0x222   :  { %v1781_v41 = vpop.f32.mrf.mxu1  ;;  %v1189_v1 = vmul.f32 %v766_v20, %v766_v20 }
 0x223   :  { %1478 = vst.msk [vmem:[#allocation3] sm:$0xff] %vm1092_vm2, %v900_v37  ;;  %v903_v8 = vadd.f32 %v1781_v41, %v2548_v51  ;;  %v935_v42 = vmul.f32 %v1781_v41, %v3132_v5  ;;  %v1192_v47 = vmul.f32 %v1781_v41, %v1781_v41  ;;  %v1889_v5 = vld [vmem:[%s3066_s1 + $0x70] sm:$0xff] }
 0x224   :  { %v769_v17 = vpop.f32.mrf.mxu1 }
 0x225   :  { %1481 = vst.msk [vmem:[#allocation3 + $0x18] sm:$0xff] %vm1092_vm2, %v903_v8  ;;  %v901_v30 = vadd.f32 %v2548_v51, %v769_v17  ;;  %996 = vrot.lane.b32.xlu0 %v932_v18, %s1932_s10  ;;  %1253 = vrot.lane.b32.xlu1 %v1189_v1, %s1932_s10  ;;  %v1190_v14 = vmul.f32 %v769_v17, %v769_v17 }
 0x226   :  { %v933_v15 = vmul.f32 %v769_v17, %v3134_v7  ;;  %v1888_v17 = vld [vmem:[%s3066_s1 + $0x48] sm:$0xff]  ;;  %v1890_v7 = vld [vmem:[%s3066_s1 + $0x60] sm:$0xff] }
 0x227   :  { %1479 = vst.msk [vmem:[#allocation3 + $0x8] sm:$0xff] %vm1092_vm2, %v901_v30 }
 0x229   :  { %v1784_v21 = vpop.f32.mrf.mxu1  ;;  %1255 = vrot.lane.b32.xlu0 %v1190_v14, %s1932_s10  ;;  %1002 = vrot.lane.b32.xlu1 %v935_v42, %s1932_s10 }
 0x22a   :  { %v906_v35 = vadd.f32 %v1784_v21, %v2548_v51  ;;  %v938_v31 = vmul.f32 %v1784_v21, %v3133_v55  ;;  %v1195_v22 = vmul.f32 %v1784_v21, %v1784_v21 }
 0x22b   :  { %v782_v3 = vpop.f32.mrf.mxu1 }
 0x22c   :  { %1484 = vst.msk [vmem:[#allocation3 + $0x30] sm:$0xff] %vm1092_vm2, %v906_v35  ;;  %v904_v59 = vadd.f32 %v2548_v51, %v782_v3  ;;  %v936_v52 = vmul.f32 %v782_v3, %v3135_v44  ;;  %v1193_v39 = vmul.f32 %v782_v3, %v782_v3 }
 0x22d   :  { %v1785_v49 = vpop.f32.mrf.mxu1  ;;  %1008 = vrot.lane.b32.xlu0 %v938_v31, %s1932_s10  ;;  %1259 = vrot.lane.b32.xlu1 %v1192_v47, %s1932_s10 }
 0x22e   :  { %1482 = vst.msk [vmem:[#allocation3 + $0x20] sm:$0xff] %vm1092_vm2, %v904_v59  ;;  %v907_v10 = vadd.f32 %v1785_v49, %v2548_v51  ;;  %v939_v61 = vmul.f32 %v1785_v49, %v3136_v2  ;;  %v1196_v40 = vmul.f32 %v1785_v49, %v1785_v49 }
 0x22f   :  { %v785_v56 = vpop.f32.mrf.mxu1 }
 0x230   :  { %1485 = vst.msk [vmem:[#allocation3 + $0x38] sm:$0xff] %vm1092_vm2, %v907_v10  ;;  %v905_v19 = vadd.f32 %v2548_v51, %v785_v56  ;;  %v937_v36 = vmul.f32 %v1886_v6, %v785_v56  ;;  %v1194_v48 = vmul.f32 %v785_v56, %v785_v56 }
 0x231   :  { %v1788_v23 = vpop.f32.mrf.mxu1  ;;  %1265 = vrot.lane.b32.xlu0 %v1195_v22, %s1932_s10  ;;  %998 = vrot.lane.b32.xlu1 %v933_v15, %s1932_s10  ;;  %v1891_v22 = vld [vmem:[%s3066_s1 + $0x78] sm:$0xff] }
 0x232   :  { %1483 = vst.msk [vmem:[#allocation3 + $0x28] sm:$0xff] %vm1092_vm2, %v905_v19  ;;  %v910_v50 = vadd.f32 %v1788_v23, %v2548_v51  ;;  %v942_v0 = vmul.f32 %v1788_v23, %v3137_v34  ;;  %v1199_v57 = vmul.f32 %v1788_v23, %v1788_v23 }
 0x233   :  { %v798_v9 = vpop.f32.mrf.mxu1 }
 0x234   :  { %1488 = vst.msk [vmem:[#allocation3 + $0x50] sm:$0xff] %vm1092_vm2, %v910_v50  ;;  %v908_v12 = vadd.f32 %v2548_v51, %v798_v9  ;;  %v940_v26 = vmul.f32 %v1887_v28, %v798_v9  ;;  %v1197_v37 = vmul.f32 %v798_v9, %v798_v9 }
 0x235   :  { %v1789_v53 = vpop.f32.mrf.mxu1  ;;  %1004 = vrot.lane.b32.xlu0 %v936_v52, %s1932_s10  ;;  %1010 = vrot.lane.b32.xlu1 %v939_v61, %s1932_s10 }
 0x236   :  { %1486 = vst.msk [vmem:[#allocation3 + $0x40] sm:$0xff] %vm1092_vm2, %v908_v12  ;;  %v911_v29 = vadd.f32 %v1789_v53, %v2548_v51  ;;  %v943_v46 = vmul.f32 %v1789_v53, %v3138_v38  ;;  %v1200_v41 = vmul.f32 %v1789_v53, %v1789_v53  ;;  %v1898_v38 = vld [vmem:[%s3066_s1 + $0xa0] sm:$0xff] }
 0x237   :  { %v801_v11 = vpop.f32.mrf.mxu1 }
 0x238   :  { %1489 = vst.msk [vmem:[#allocation3 + $0x58] sm:$0xff] %vm1092_vm2, %v911_v29  ;;  %v909_v16 = vadd.f32 %v2548_v51, %v801_v11  ;;  %v941_v30 = vmul.f32 %v1888_v17, %v801_v11  ;;  %v1198_v31 = vmul.f32 %v801_v11, %v801_v11  ;;  %v1892_v29 = vld [vmem:[%s3066_s1 + $0x68] sm:$0xff]  ;;  %v1902_v17 = vld [vmem:[%s3066_s1 + $0xc0] sm:$0xff] }
 0x239   :  { %v1792_v62 = vpop.f32.mrf.mxu1  ;;  %1261 = vrot.lane.b32.xlu0 %v1193_v39, %s1932_s10  ;;  %1267 = vrot.lane.b32.xlu1 %v1196_v40, %s1932_s10  ;;  %v1893_v40 = vld [vmem:[%s3066_s1 + $0x90] sm:$0xff] }
 0x23a   :  { %1487 = vst.msk [vmem:[#allocation3 + $0x48] sm:$0xff] %vm1092_vm2, %v909_v16  ;;  %v914_v25 = vadd.f32 %v1792_v62, %v2548_v51  ;;  %v946_v42 = vmul.f32 %v1889_v5, %v1792_v62  ;;  %v1203_v47 = vmul.f32 %v1792_v62, %v1792_v62  ;;  %v1903_v5 = vld [vmem:[%s3066_s1 + $0xd8] sm:$0xff] }
 0x23b   :  { %v2600_v63 = vpop.f32.mrf.mxu1 }
 0x23c   :  { %1492 = vst.msk [vmem:[#allocation3 + $0x70] sm:$0xff] %vm1092_vm2, %v914_v25  ;;  %v912_v32 = vadd.f32 %v2548_v51, %v2600_v63  ;;  %v944_v15 = vmul.f32 %v1890_v7, %v2600_v63  ;;  %v1201_v52 = vmul.f32 %v2600_v63, %v2600_v63  ;;  %v1907_v7 = vld [vmem:[%s3066_s1 + $0xf8] sm:$0xff] }
 0x23d   :  { %v2605_v60 = vpop.f32.mrf.mxu1  ;;  %1016 = vrot.lane.b32.xlu0 %v942_v0, %s1932_s10  ;;  %1006 = vrot.lane.b32.xlu1 %v937_v36, %s1932_s10 }
 0x23e   :  { %1490 = vst.msk [vmem:[#allocation3 + $0x60] sm:$0xff] %vm1092_vm2, %v912_v32  ;;  %v915_v27 = vadd.f32 %v2605_v60, %v2548_v51  ;;  %v947_v56 = vmul.f32 %v1891_v22, %v2605_v60  ;;  %v1204_v2 = vmul.f32 %v2605_v60, %v2605_v60  ;;  %v1894_v32 = vld [vmem:[%s3066_s1 + $0x80] sm:$0xff] }
 0x23f   :  { %v2612_v4 = vpop.f32.mrf.mxu1 }
 0x240   :  { %1493 = vst.msk [vmem:[#allocation3 + $0x78] sm:$0xff] %vm1092_vm2, %v915_v27  ;;  %v913_v54 = vadd.f32 %v2548_v51, %v2612_v4  ;;  %v945_v39 = vmul.f32 %v1892_v29, %v2612_v4  ;;  %v1202_v36 = vmul.f32 %v2612_v4, %v2612_v4  ;;  %v1895_v27 = vld [vmem:[%s3066_s1 + $0x98] sm:$0xff]  ;;  %v1896_v4 = vld [vmem:[%s3066_s1 + $0x88] sm:$0xff] }
 0x241   :  { %v2617_v33 = vpop.f32.mrf.mxu1  ;;  %1273 = vrot.lane.b32.xlu0 %v1199_v57, %s1932_s10  ;;  %1263 = vrot.lane.b32.xlu1 %v1194_v48, %s1932_s10 }
 0x242   :  { %1491 = vst.msk [vmem:[#allocation3 + $0x68] sm:$0xff] %vm1092_vm2, %v913_v54  ;;  %v918_v43 = vadd.f32 %v2617_v33, %v2548_v51  ;;  %v950_v11 = vmul.f32 %v1893_v40, %v2617_v33  ;;  %v1207_v34 = vmul.f32 %v2617_v33, %v2617_v33  ;;  %v1897_v33 = vld [vmem:[%s3066_s1 + $0xb0] sm:$0xff] }
 0x243   :  { %v2628_v45 = vpop.f32.mrf.mxu1 }
 0x244   :  { %1496 = vst.msk [vmem:[#allocation3 + $0x90] sm:$0xff] %vm1092_vm2, %v918_v43  ;;  %v916_v24 = vadd.f32 %v2548_v51, %v2628_v45  ;;  %v948_v60 = vmul.f32 %v1894_v32, %v2628_v45 }
 0x245   :  { %v2633_v13 = vpop.f32.mrf.mxu1  ;;  %1012 = vrot.lane.b32.xlu0 %v940_v26, %s1932_s10  ;;  %1018 = vrot.lane.b32.xlu1 %v943_v46, %s1932_s10 }
 0x246   :  { %1494 = vst.msk [vmem:[#allocation3 + $0x80] sm:$0xff] %vm1092_vm2, %v916_v24  ;;  %v919_v20 = vadd.f32 %v2633_v13, %v2548_v51  ;;  %v951_v48 = vmul.f32 %v1895_v27, %v2633_v13  ;;  %v1208_v57 = vmul.f32 %v2633_v13, %v2633_v13 }
 0x247   :  { %v2640_v58 = vpop.f32.mrf.mxu1 }
 0x248   :  { %1497 = vst.msk [vmem:[#allocation3 + $0x98] sm:$0xff] %vm1092_vm2, %v919_v20  ;;  %v917_v18 = vadd.f32 %v2548_v51, %v2640_v58  ;;  %v949_v54 = vmul.f32 %v1896_v4, %v2640_v58  ;;  %v1206_v28 = vmul.f32 %v2640_v58, %v2640_v58  ;;  %v1901_v58 = vld [vmem:[%s3066_s1 + $0xd0] sm:$0xff] }
 0x249   :  { %v2645_v1 = vpop.f32.mrf.mxu1  ;;  %1269 = vrot.lane.b32.xlu0 %v1197_v37, %s1932_s10  ;;  %1275 = vrot.lane.b32.xlu1 %v1200_v41, %s1932_s10  ;;  %v1900_v37 = vld [vmem:[%s3066_s1 + $0xa8] sm:$0xff] }
 0x24a   :  { %1495 = vst.msk [vmem:[#allocation3 + $0x88] sm:$0xff] %vm1092_vm2, %v917_v18  ;;  %v922_v8 = vadd.f32 %v2645_v1, %v2548_v51  ;;  %v954_v43 = vmul.f32 %v1897_v33, %v2645_v1  ;;  %v1211_v26 = vmul.f32 %v2645_v1, %v2645_v1 }
 0x24b   :  { %v2658_v14 = vpop.f32.mrf.mxu1 }
 0x24c   :  { %1500 = vst.msk [vmem:[#allocation3 + $0xb0] sm:$0xff] %vm1092_vm2, %v922_v8  ;;  %v920_v21 = vadd.f32 %v2548_v51, %v2658_v14  ;;  %v952_v46 = vmul.f32 %v1898_v38, %v2658_v14  ;;  %v1209_v13 = vmul.f32 %v2658_v14, %v2658_v14 }
 0x24d   :  { %v2663_v35 = vpop.f32.mrf.mxu1  ;;  %1024 = vrot.lane.b32.xlu0 %v946_v42, %s1932_s10  ;;  %1014 = vrot.lane.b32.xlu1 %v941_v30, %s1932_s10 }
 0x24e   :  { %1498 = vst.msk [vmem:[#allocation3 + $0xa0] sm:$0xff] %vm1092_vm2, %v920_v21  ;;  %v923_v55 = vadd.f32 %v2663_v35, %v2548_v51  ;;  %v1212_v20 = vmul.f32 %v2663_v35, %v2663_v35 }
 0x24f   :  { %v2670_v3 = vpop.f32.mrf.mxu1 }
 0x250   :  { %1501 = vst.msk [vmem:[#allocation3 + $0xb8] sm:$0xff] %vm1092_vm2, %v923_v55  ;;  %v921_v59 = vadd.f32 %v2548_v51, %v2670_v3  ;;  %v953_v41 = vmul.f32 %v1900_v37, %v2670_v3  ;;  %v1210_v1 = vmul.f32 %v2670_v3, %v2670_v3 }
 0x251   :  { %v2675_v49 = vpop.f32.mrf.mxu1  ;;  %1281 = vrot.lane.b32.xlu0 %v1203_v47, %s1932_s10  ;;  %1271 = vrot.lane.b32.xlu1 %v1198_v31, %s1932_s10  ;;  %v1905_v31 = vld [vmem:[%s3066_s1 + $0xf0] sm:$0xff] }
 0x252   :  { %1499 = vst.msk [vmem:[#allocation3 + $0xa8] sm:$0xff] %vm1092_vm2, %v921_v59  ;;  %v926_v10 = vadd.f32 %v2675_v49, %v2548_v51  ;;  %v958_v18 = vmul.f32 %v1901_v58, %v2675_v49  ;;  %v1215_v8 = vmul.f32 %v2675_v49, %v2675_v49  ;;  %v1906_v49 = vld [vmem:[%s3066_s1 + $0xe0] sm:$0xff] }
 0x253   :  { %v2690_v19 = vpop.f32.mrf.mxu1 }
 0x254   :  { %1504 = vst.msk [vmem:[#allocation3 + $0xd0] sm:$0xff] %vm1092_vm2, %v926_v10  ;;  %v924_v23 = vadd.f32 %v2548_v51, %v2690_v19  ;;  %v956_v30 = vmul.f32 %v1902_v17, %v2690_v19  ;;  %v1213_v14 = vmul.f32 %v2690_v19, %v2690_v19 }
 0x255   :  { %v2695_v50 = vpop.f32.mrf.mxu1  ;;  %1020 = vrot.lane.b32.xlu0 %v944_v15, %s1932_s10  ;;  %1026 = vrot.lane.b32.xlu1 %v947_v56, %s1932_s10 }
 0x256   :  { %1502 = vst.msk [vmem:[#allocation3 + $0xc0] sm:$0xff] %vm1092_vm2, %v924_v23  ;;  %v927_v44 = vadd.f32 %v2695_v50, %v2548_v51  ;;  %v959_v42 = vmul.f32 %v1903_v5, %v2695_v50  ;;  %v1216_v21 = vmul.f32 %v2695_v50, %v2695_v50 }
 0x257   :  { %v2706_v61 = vpop.f32.mrf.mxu1 }
 0x258   :  { %1505 = vst.msk [vmem:[#allocation3 + $0xd8] sm:$0xff] %vm1092_vm2, %v927_v44  ;;  %v925_v9 = vadd.f32 %v2548_v51, %v2706_v61  ;;  %v1214_v3 = vmul.f32 %v2706_v61, %v2706_v61 }
 0x259   :  { %1277 = vrot.lane.b32.xlu0 %v1201_v52, %s1932_s10  ;;  %1283 = vrot.lane.b32.xlu1 %v1204_v2, %s1932_s10  ;;  %v2713_v12 = vpop.f32.mrf.mxu1  ;;  %v1908_v52 = vld [vmem:[%s3066_s1 + $0xe8] sm:$0xff] }
 0x25a   :  { %1503 = vst.msk [vmem:[#allocation3 + $0xc8] sm:$0xff] %vm1092_vm2, %v925_v9  ;;  %v930_v53 = vadd.f32 %v2713_v12, %v2548_v51  ;;  %v962_v47 = vmul.f32 %v1905_v31, %v2713_v12  ;;  %v1219_v59 = vmul.f32 %v2713_v12, %v2713_v12 }
 0x25b   :  { %v2726_v16 = vpop.f32.mrf.mxu1 }
 0x25c   :  { %1508 = vst.msk [vmem:[#allocation3 + $0xf0] sm:$0xff] %vm1092_vm2, %v930_v53  ;;  %v928_v62 = vadd.f32 %v2548_v51, %v2726_v16  ;;  %v960_v10 = vmul.f32 %v1906_v49, %v2726_v16  ;;  %v1217_v19 = vmul.f32 %v2726_v16, %v2726_v16 }
 0x25d   :  { %1032 = vrot.lane.b32.xlu0 %v950_v11, %s1932_s10  ;;  %1022 = vrot.lane.b32.xlu1 %v945_v39, %s1932_s10  ;;  %v2733_v25 = vpop.f32.mrf.mxu1 }
 0x25e   :  { %1506 = vst.msk [vmem:[#allocation3 + $0xe0] sm:$0xff] %vm1092_vm2, %v928_v62  ;;  %v931_v6 = vadd.f32 %v2733_v25, %v2548_v51  ;;  %v963_v15 = vmul.f32 %v1907_v7, %v2733_v25  ;;  %v1220_v23 = vmul.f32 %v2733_v25, %v2733_v25 }
 0x25f   :  { %v2742_v0 = vpop.f32.mrf.mxu1 }
 0x260   :  { %1509 = vst.msk [vmem:[#allocation3 + $0xf8] sm:$0xff] %vm1092_vm2, %v931_v6  ;;  %v929_v63 = vadd.f32 %v2548_v51, %v2742_v0  ;;  %v1205_v51 = vmul.f32 %v2628_v45, %v2628_v45  ;;  %v1899_v45 = vld [vmem:[%s3066_s1 + $0xb8] sm:$0xff]  ;;  %v961_v2 = vmul.f32 %v1908_v52, %v2742_v0  ;;  %v1218_v12 = vmul.f32 %v2742_v0, %v2742_v0 }
 0x261   :  { %1289 = vrot.lane.b32.xlu0 %v1207_v34, %s1932_s10  ;;  %1279 = vrot.lane.b32.xlu1 %v1202_v36, %s1932_s10  ;;  %v955_v24 = vmul.f32 %v1899_v45, %v2663_v35  ;;  %v1904_v35 = vld [vmem:[%s3066_s1 + $0xc8] sm:$0xff]  ;;  %s1934_s1 = smov [#allocation3]  }
 0x262   :  { %1507 = vst.msk [vmem:[#allocation3 + $0xe8] sm:$0xff] %vm1092_vm2, %v929_v63  ;;  %v957_v55 = vmul.f32 %v1904_v35, %v2706_v61 }
 0x265   :  { %1028 = vrot.lane.b32.xlu0 %v948_v60, %s1932_s10  ;;  %1034 = vrot.lane.b32.xlu1 %v951_v48, %s1932_s10 }
 0x269   :  { %1285 = vrot.lane.b32.xlu0 %v1205_v51, %s1932_s10  ;;  %1291 = vrot.lane.b32.xlu1 %v1208_v57, %s1932_s10 }
 0x26d   :  { %1040 = vrot.lane.b32.xlu0 %v954_v43, %s1932_s10  ;;  %1030 = vrot.lane.b32.xlu1 %v949_v54, %s1932_s10 }
 0x271   :  { %1297 = vrot.lane.b32.xlu0 %v1211_v26, %s1932_s10  ;;  %1287 = vrot.lane.b32.xlu1 %v1206_v28, %s1932_s10 }
 0x275   :  { %1036 = vrot.lane.b32.xlu0 %v952_v46, %s1932_s10  ;;  %1042 = vrot.lane.b32.xlu1 %v955_v24, %s1932_s10 }
 0x279   :  { %1293 = vrot.lane.b32.xlu0 %v1209_v13, %s1932_s10  ;;  %1299 = vrot.lane.b32.xlu1 %v1212_v20, %s1932_s10 }
 0x27d   :  { %1048 = vrot.lane.b32.xlu0 %v958_v18, %s1932_s10  ;;  %1038 = vrot.lane.b32.xlu1 %v953_v41, %s1932_s10 }
 0x281   :  { %1305 = vrot.lane.b32.xlu0 %v1215_v8, %s1932_s10  ;;  %1295 = vrot.lane.b32.xlu1 %v1210_v1, %s1932_s10 }
 0x285   :  { %1044 = vrot.lane.b32.xlu0 %v956_v30, %s1932_s10  ;;  %1050 = vrot.lane.b32.xlu1 %v959_v42, %s1932_s10 }
 0x289   :  { %1301 = vrot.lane.b32.xlu0 %v1213_v14, %s1932_s10  ;;  %1307 = vrot.lane.b32.xlu1 %v1216_v21, %s1932_s10 }
 0x28d   :  { %1046 = vrot.lane.b32.xlu1 %v957_v55, %s1932_s10  ;;  %1056 = vrot.lane.b32.xlu0 %v962_v47, %s1932_s10 }
 0x291   :  { %1303 = vrot.lane.b32.xlu1 %v1214_v3, %s1932_s10  ;;  %1313 = vrot.lane.b32.xlu0 %v1219_v59, %s1932_s10 }
 0x293   :  { %v1001_v22 = vpop.permute.xlu0 %1000  ;;  %v1258_v56 = vpop.permute.xlu1 %1257 }
 0x294   :  { %v1099_v27 = vsel %vm1092_vm2, %v1001_v22, 0.0  ;;  %v1355_v51 = vsel %vm1092_vm2, %v1258_v56, 0.0 }
 0x295   :  { %1052 = vrot.lane.b32.xlu0 %v960_v10, %s1932_s10  ;;  %1058 = vrot.lane.b32.xlu1 %v963_v15, %s1932_s10 }
 0x297   :  { %v997_v50 = vpop.permute.xlu0 %996  ;;  %v1254_v44 = vpop.permute.xlu1 %1253 }
 0x298   :  { %v1093_v54 = vsel %vm1092_vm2, %v997_v50, 0.0  ;;  %v1349_v43 = vsel %vm1092_vm2, %v1254_v44, 0.0 }
 0x299   :  { %1309 = vrot.lane.b32.xlu0 %v1217_v19, %s1932_s10  ;;  %1315 = vrot.lane.b32.xlu1 %v1220_v23, %s1932_s10 }
 0x29b   :  { %v1256_v61 = vpop.permute.xlu0 %1255  ;;  %v1003_v9 = vpop.permute.xlu1 %1002 }
 0x29c   :  { %v1102_v46 = vsel %vm1092_vm2, %v1003_v9, 0.0  ;;  %v1352_v45 = vsel %vm1092_vm2, %v1256_v61, 0.0 }
 0x29d   :  { %1054 = vrot.lane.b32.xlu1 %v961_v2, %s1932_s10 }
 0x29f   :  { %v1009_v53 = vpop.permute.xlu0 %1008  ;;  %v1260_v29 = vpop.permute.xlu1 %1259 }
 0x2a0   :  { %v1358_v20 = vsel %vm1092_vm2, %v1260_v29, 0.0  ;;  %v1111_v37 = vsel %vm1092_vm2, %v1009_v53, 0.0 }
 0x2a1   :  { %1311 = vrot.lane.b32.xlu1 %v1218_v12, %s1932_s10  ;;  %s1646_s10 = sshll.u32 %s1934_s1, 4  ;;  %s1647_s10 = int_to_ptr.vmem [resolvable:$true] %s1646_s10 }
 0x2a2   :  { %s1909_s27 = scalar_lea.vmem %s1647_s10, 4096  ;;  %p1914_p1 = scmp.lt.s32.totalorder %s1647_s10, %s1647_s10 }
 0x2a3   :  { %v1266_v39 = vpop.permute.xlu0 %1265  ;;  %v999_v40 = vpop.permute.xlu1 %998  ;;  %p1910_p0 = scmp.ne.s32.totalorder %s1647_s10, %s1909_s27  ;;  %p1915_p2 = scmp.lt.s32.totalorder %s1909_s27, %s1909_s27 }
 0x2a4   :  { %v1096_v28 = vsel %vm1092_vm2, %v999_v40, 0.0  ;;  %v1367_v18 = vsel %vm1092_vm2, %v1266_v39, 0.0 }
 0x2a5   :  { %p1916_p3 = por %p1915_p2, %p1914_p1 }
 0x2a7   :  { %v1005_v11 = vpop.permute.xlu0 %1004  ;;  %v1011_v16 = vpop.permute.xlu1 %1010  ;;  %p1917_p4 = pnand %p1916_p3, %p1910_p0 }
 0x2a8   :  { %v1114_v58 = vsel %vm1092_vm2, %v1011_v16, 0.0  ;;  %v1105_v30 = vsel %vm1092_vm2, %v1005_v11, 0.0 }
 0x2ab   :  { %v1262_v62 = vpop.permute.xlu0 %1261  ;;  %v1268_v25 = vpop.permute.xlu1 %1267 }
 0x2ac   :  { %v1370_v8 = vsel %vm1092_vm2, %v1268_v25, 0.0  ;;  %v1361_v14 = vsel %vm1092_vm2, %v1262_v62, 0.0 }
 0x2af   :  { %v1017_v6 = vpop.permute.xlu0 %1016  ;;  %v1007_v36 = vpop.permute.xlu1 %1006 }
 0x2b0   :  { %v1108_v42 = vsel %vm1092_vm2, %v1007_v36, 0.0  ;;  %v1123_v55 = vsel %vm1092_vm2, %v1017_v6, 0.0 }
 0x2b3   :  { %v1274_v34 = vpop.permute.xlu0 %1273  ;;  %v1264_v63 = vpop.permute.xlu1 %1263 }
 0x2b4   :  { %v1364_v35 = vsel %vm1092_vm2, %v1264_v63, 0.0  ;;  %v1379_v59 = vsel %vm1092_vm2, %v1274_v34, 0.0 }
 0x2b7   :  { %v1013_v32 = vpop.permute.xlu0 %1012  ;;  %v1019_v60 = vpop.permute.xlu1 %1018 }
 0x2b8   :  { %1100 = vadd.xlane.f32.xlu0 %v1099_v27  ;;  %v1126_v47 = vsel %vm1092_vm2, %v1019_v60, 0.0  ;;  %v1117_v7 = vsel %vm1092_vm2, %v1013_v32, 0.0 }
 0x2bb   :  { %v1270_v0 = vpop.permute.xlu0 %1269  ;;  %v1276_v48 = vpop.permute.xlu1 %1275 }
 0x2bc   :  { %1356 = vadd.xlane.f32.xlu0 %v1355_v51  ;;  %v1382_v10 = vsel %vm1092_vm2, %v1276_v48, 0.0  ;;  %v1373_v56 = vsel %vm1092_vm2, %v1270_v0, 0.0 }
 0x2bf   :  { %v1025_v57 = vpop.permute.xlu0 %1024  ;;  %v1015_v4 = vpop.permute.xlu1 %1014 }
 0x2c0   :  { %1094 = vadd.xlane.f32.xlu0 %v1093_v54  ;;  %v1120_v22 = vsel %vm1092_vm2, %v1015_v4, 0.0  ;;  %v1135_v44 = vsel %vm1092_vm2, %v1025_v57, 0.0 }
 0x2c3   :  { %v1272_v33 = vpop.permute.xlu1 %1271  ;;  %v1282_v26 = vpop.permute.xlu0 %1281 }
 0x2c4   :  { %1350 = vadd.xlane.f32.xlu0 %v1349_v43  ;;  %v1376_v23 = vsel %vm1092_vm2, %v1272_v33, 0.0  ;;  %v1391_v61 = vsel %vm1092_vm2, %v1282_v26, 0.0 }
 0x2c5   :  { %1097 = vadd.xlane.f32.xlu1 %v1096_v28 }
 0x2c7   :  { %v1027_v38 = vpop.permute.xlu1 %1026  ;;  %v1021_v24 = vpop.permute.xlu0 %1020 }
 0x2c8   :  { %1103 = vadd.xlane.f32.xlu0 %v1102_v46  ;;  %v1138_v2 = vsel %vm1092_vm2, %v1027_v38, 0.0  ;;  %v1129_v53 = vsel %vm1092_vm2, %v1021_v24, 0.0 }
 0x2c9   :  { %1353 = vadd.xlane.f32.xlu1 %v1352_v45 }
 0x2cb   :  { %v1284_v13 = vpop.permute.xlu1 %1283  ;;  %v1278_v1 = vpop.permute.xlu0 %1277 }
 0x2cc   :  { %1359 = vadd.xlane.f32.xlu0 %v1358_v20  ;;  %v1394_v12 = vsel %vm1092_vm2, %v1284_v13, 0.0  ;;  %v1385_v11 = vsel %vm1092_vm2, %v1278_v1, 0.0 }
 0x2cd   :  { %1112 = vadd.xlane.f32.xlu1 %v1111_v37 }
 0x2cf   :  { %v1023_v41 = vpop.permute.xlu1 %1022  ;;  %v1033_v5 = vpop.permute.xlu0 %1032 }
 0x2d0   :  { %1115 = vadd.xlane.f32.xlu0 %v1114_v58  ;;  %v1132_v39 = vsel %vm1092_vm2, %v1023_v41, 0.0  ;;  %v1147_v25 = vsel %vm1092_vm2, %v1033_v5, 0.0 }
 0x2d1   :  { %1368 = vadd.xlane.f32.xlu1 %v1367_v18 }
 0x2d3   :  { %v1280_v17 = vpop.permute.xlu1 %1279  ;;  %v1290_v31 = vpop.permute.xlu0 %1289 }
 0x2d4   :  { %1371 = vadd.xlane.f32.xlu0 %v1370_v8  ;;  %v1388_v16 = vsel %vm1092_vm2, %v1280_v17, 0.0  ;;  %v1403_v34 = vsel %vm1092_vm2, %v1290_v31, 0.0 }
 0x2d5   :  { %1106 = vadd.xlane.f32.xlu1 %v1105_v30 }
 0x2d7   :  { %v1035_v21 = vpop.permute.xlu1 %1034  ;;  %v1029_v49 = vpop.permute.xlu0 %1028 }
 0x2d8   :  { %1109 = vadd.xlane.f32.xlu0 %v1108_v42  ;;  %v1150_v36 = vsel %vm1092_vm2, %v1035_v21, 0.0  ;;  %v1141_v60 = vsel %vm1092_vm2, %v1029_v49, 0.0 }
 0x2d9   :  { %1362 = vadd.xlane.f32.xlu1 %v1361_v14 }
 0x2db   :  { %v1292_v3 = vpop.permute.xlu1 %1291  ;;  %v1286_v19 = vpop.permute.xlu0 %1285 }
 0x2dc   :  { %1365 = vadd.xlane.f32.xlu0 %v1364_v35  ;;  %v1406_v32 = vsel %vm1092_vm2, %v1292_v3, 0.0  ;;  %v1397_v51 = vsel %vm1092_vm2, %v1286_v19, 0.0 }
 0x2dd   :  { %1124 = vadd.xlane.f32.xlu1 %v1123_v55 }
 0x2df   :  { %v1031_v15 = vpop.permute.xlu1 %1030  ;;  %v1041_v52 = vpop.permute.xlu0 %1040 }
 0x2e0   :  { %1127 = vadd.xlane.f32.xlu0 %v1126_v47  ;;  %v1144_v0 = vsel %vm1092_vm2, %v1031_v15, 0.0  ;;  %v1159_v54 = vsel %vm1092_vm2, %v1041_v52, 0.0 }
 0x2e1   :  { %1380 = vadd.xlane.f32.xlu1 %v1379_v59 }
 0x2e3   :  { %v1288_v50 = vpop.permute.xlu1 %1287  ;;  %v1298_v29 = vpop.permute.xlu0 %1297 }
 0x2e4   :  { %1383 = vadd.xlane.f32.xlu0 %v1382_v10  ;;  %v1400_v4 = vsel %vm1092_vm2, %v1288_v50, 0.0  ;;  %v1415_v28 = vsel %vm1092_vm2, %v1298_v29, 0.0 }
 0x2e5   :  { %1118 = vadd.xlane.f32.xlu1 %v1117_v7 }
 0x2e7   :  { %v1043_v9 = vpop.permute.xlu1 %1042  ;;  %v1037_v62 = vpop.permute.xlu0 %1036 }
 0x2e8   :  { %1121 = vadd.xlane.f32.xlu0 %v1120_v22  ;;  %v1162_v43 = vsel %vm1092_vm2, %v1043_v9, 0.0  ;;  %v1153_v45 = vsel %vm1092_vm2, %v1037_v62, 0.0  ;;  %v1933_v9 = vmov 0.0  }
 0x2e9   :  { %1374 = vadd.xlane.f32.xlu1 %v1373_v56 }
 0x2eb   :  { %v1300_v40 = vpop.permute.xlu1 %1299  ;;  %v1294_v63 = vpop.permute.xlu0 %1293 }
 0x2ec   :  { %1377 = vadd.xlane.f32.xlu0 %v1376_v23  ;;  %v1418_v38 = vsel %vm1092_vm2, %v1300_v40, 0.0  ;;  %v1409_v20 = vsel %vm1092_vm2, %v1294_v63, 0.0 }
 0x2ed   :  { %1136 = vadd.xlane.f32.xlu1 %v1135_v44 }
 0x2ef   :  { %v1039_v6 = vpop.permute.xlu1 %1038  ;;  %v1049_v48 = vpop.permute.xlu0 %1048 }
 0x2f0   :  { %1139 = vadd.xlane.f32.xlu0 %v1138_v2  ;;  %v1156_v13 = vsel %vm1092_vm2, %v1039_v6, 0.0  ;;  %v1171_v58 = vsel %vm1092_vm2, %v1049_v48, 0.0 }
 0x2f1   :  { %1392 = vadd.xlane.f32.xlu1 %v1391_v61 }
 0x2f3   :  { %v1296_v27 = vpop.permute.xlu1 %1295  ;;  %v1306_v33 = vpop.permute.xlu0 %1305 }
 0x2f4   :  { %1395 = vadd.xlane.f32.xlu0 %v1394_v12  ;;  %v1412_v41 = vsel %vm1092_vm2, %v1296_v27, 0.0  ;;  %v1427_v17 = vsel %vm1092_vm2, %v1306_v33, 0.0 }
 0x2f5   :  { %1130 = vadd.xlane.f32.xlu1 %v1129_v53 }
 0x2f7   :  { %v1051_v57 = vpop.permute.xlu1 %1050  ;;  %v1045_v46 = vpop.permute.xlu0 %1044 }
 0x2f8   :  { %1133 = vadd.xlane.f32.xlu0 %v1132_v39  ;;  %v1174_v1 = vsel %vm1092_vm2, %v1051_v57, 0.0  ;;  %v1165_v42 = vsel %vm1092_vm2, %v1045_v46, 0.0 }
 0x2f9   :  { %1386 = vadd.xlane.f32.xlu1 %v1385_v11 }
 0x2fb   :  { %v1308_v26 = vpop.permute.xlu1 %1307  ;;  %v1302_v37 = vpop.permute.xlu0 %1301 }
 0x2fc   :  { %1389 = vadd.xlane.f32.xlu0 %v1388_v16  ;;  %v1430_v5 = vsel %vm1092_vm2, %v1308_v26, 0.0  ;;  %v1421_v35 = vsel %vm1092_vm2, %v1302_v37, 0.0 }
 0x2fd   :  { %1148 = vadd.xlane.f32.xlu1 %v1147_v25 }
 0x2ff   :  { %v1047_v24 = vpop.permute.xlu1 %1046  ;;  %v1057_v8 = vpop.permute.xlu0 %1056 }
 0x300   :  { %1151 = vadd.xlane.f32.xlu0 %v1150_v36  ;;  %v1168_v21 = vsel %vm1092_vm2, %v1047_v24, 0.0  ;;  %v1183_v3 = vsel %vm1092_vm2, %v1057_v8, 0.0 }
 0x301   :  { %1404 = vadd.xlane.f32.xlu1 %v1403_v34 }
 0x303   :  { %v1304_v18 = vpop.permute.xlu1 %1303  ;;  %v1314_v14 = vpop.permute.xlu0 %1313 }
 0x304   :  { %1407 = vadd.xlane.f32.xlu0 %v1406_v32  ;;  %v1424_v31 = vsel %vm1092_vm2, %v1304_v18, 0.0  ;;  %v1439_v23 = vsel %vm1092_vm2, %v1314_v14, 0.0 }
 0x305   :  { %1142 = vadd.xlane.f32.xlu1 %v1141_v60 }
 0x307   :  { %v1059_v30 = vpop.permute.xlu1 %1058  ;;  %v1053_v47 = vpop.permute.xlu0 %1052 }
 0x308   :  { %1145 = vadd.xlane.f32.xlu0 %v1144_v0  ;;  %v1186_v49 = vsel %vm1092_vm2, %v1059_v30, 0.0  ;;  %v1177_v10 = vsel %vm1092_vm2, %v1053_v47, 0.0 }
 0x309   :  { %1398 = vadd.xlane.f32.xlu1 %v1397_v51 }
 0x30b   :  { %v1316_v55 = vpop.permute.xlu1 %1315  ;;  %v1310_v7 = vpop.permute.xlu0 %1309 }
 0x30c   :  { %1401 = vadd.xlane.f32.xlu0 %v1400_v4  ;;  %v1433_v22 = vsel %vm1092_vm2, %v1310_v7, 0.0  ;;  %v1442_v50 = vsel %vm1092_vm2, %v1316_v55, 0.0 }
 0x30d   :  { %1160 = vadd.xlane.f32.xlu1 %v1159_v54 }
 0x30f   :  { %v1055_v59 = vpop.permute.xlu1 %1054 }
 0x310   :  { %1163 = vadd.xlane.f32.xlu0 %v1162_v43  ;;  %v1180_v15 = vsel %vm1092_vm2, %v1055_v59, 0.0 }
 0x311   :  { %1416 = vadd.xlane.f32.xlu1 %v1415_v28 }
 0x313   :  { %v1312_v56 = vpop.permute.xlu1 %1311 }
 0x314   :  { %1419 = vadd.xlane.f32.xlu0 %v1418_v38  ;;  %v1436_v19 = vsel %vm1092_vm2, %v1312_v56, 0.0 }
 0x315   :  { %1154 = vadd.xlane.f32.xlu1 %v1153_v45 }
 0x318   :  { %1157 = vadd.xlane.f32.xlu0 %v1156_v13 }
 0x319   :  { %1410 = vadd.xlane.f32.xlu1 %v1409_v20 }
 0x31c   :  { %1413 = vadd.xlane.f32.xlu0 %v1412_v41 }
 0x31d   :  { %1172 = vadd.xlane.f32.xlu1 %v1171_v58 }
 0x320   :  { %1175 = vadd.xlane.f32.xlu0 %v1174_v1 }
 0x321   :  { %1428 = vadd.xlane.f32.xlu1 %v1427_v17 }
 0x324   :  { %1431 = vadd.xlane.f32.xlu0 %v1430_v5 }
 0x325   :  { %1166 = vadd.xlane.f32.xlu1 %v1165_v42 }
 0x328   :  { %1169 = vadd.xlane.f32.xlu0 %v1168_v21 }
 0x329   :  { %1422 = vadd.xlane.f32.xlu1 %v1421_v35 }
 0x32c   :  { %1425 = vadd.xlane.f32.xlu0 %v1424_v31 }
 0x32d   :  { %1184 = vadd.xlane.f32.xlu1 %v1183_v3 }
 0x330   :  { %1187 = vadd.xlane.f32.xlu0 %v1186_v49 }
 0x331   :  { %1178 = vadd.xlane.f32.xlu1 %v1177_v10 }
 0x334   :  { %1181 = vadd.xlane.f32.xlu0 %v1180_v15 }
 0x335   :  { %1434 = vadd.xlane.f32.xlu1 %v1433_v22 }
 0x338   :  { %1437 = vadd.xlane.f32.xlu0 %v1436_v19 }
 0x339   :  { %1440 = vadd.xlane.f32.xlu1 %v1439_v23 }
 0x33c   :  { %1443 = vadd.xlane.f32.xlu0 %v1442_v50 }
 0x341   :  { %v1101_v44 = vpop.xlane.xlu0 %1100 }
 0x342   :  { %v1512_v52 = vsub.f32 0.0, %v1101_v44 }
 0x344   :  { %1545 = vst.msk [vmem:[#allocation3 + $0x10] sm:$0xff] %vm1542_vm3, %v1512_v52 }
 0x345   :  { %v1357_v2 = vpop.xlane.xlu0 %1356 }
 0x346   :  { %v1448_v61 = vmul.f32 0.0625, %v1357_v2 }
 0x348   :  { %1578 = vst.msk [vmem:[#allocation3 + $0x10] sm:$0xff] %vm1575_vm4, %v1448_v61 }
 0x349   :  { %1611 = vst.msk [vmem:[#allocation3 + $0x10] sm:$0xff] %vm1608_vm5, %v1933_v9  ;;  %v1095_v12 = vpop.xlane.xlu0 %1094 }
 0x34a   :  { %v1510_v53 = vsub.f32 0.0, %v1095_v12 }
 0x34c   :  { %1543 = vst.msk [vmem:[#allocation3] sm:$0xff] %vm1542_vm3, %v1510_v53 }
 0x34d   :  { %v1351_v29 = vpop.xlane.xlu0 %1350 }
 0x34e   :  { %v1446_v39 = vmul.f32 0.0625, %v1351_v29  ;;  %v1098_v40 = vpop.xlane.xlu1 %1097 }
 0x34f   :  { %v1511_v11 = vsub.f32 0.0, %v1098_v40 }
 0x350   :  { %1576 = vst.msk [vmem:[#allocation3] sm:$0xff] %vm1575_vm4, %v1446_v39 }
 0x351   :  { %1609 = vst.msk [vmem:[#allocation3] sm:$0xff] %vm1608_vm5, %v1933_v9  ;;  %v1104_v16 = vpop.xlane.xlu0 %1103 }
 0x352   :  { %1544 = vst.msk [vmem:[#allocation3 + $0x8] sm:$0xff] %vm1542_vm3, %v1511_v11  ;;  %v1513_v62 = vsub.f32 0.0, %v1104_v16  ;;  %v1354_v25 = vpop.xlane.xlu1 %1353 }
 0x353   :  { %v1447_v6 = vmul.f32 0.0625, %v1354_v25 }
 0x354   :  { %1546 = vst.msk [vmem:[#allocation3 + $0x18] sm:$0xff] %vm1542_vm3, %v1513_v62 }
 0x355   :  { %1577 = vst.msk [vmem:[#allocation3 + $0x8] sm:$0xff] %vm1575_vm4, %v1447_v6  ;;  %v1360_v36 = vpop.xlane.xlu0 %1359 }
 0x356   :  { %1610 = vst.msk [vmem:[#allocation3 + $0x8] sm:$0xff] %vm1608_vm5, %v1933_v9  ;;  %v1449_v34 = vmul.f32 0.0625, %v1360_v36  ;;  %v1113_v63 = vpop.xlane.xlu1 %1112 }
 0x357   :  { %v1516_v32 = vsub.f32 0.0, %v1113_v63 }
 0x358   :  { %1579 = vst.msk [vmem:[#allocation3 + $0x18] sm:$0xff] %vm1575_vm4, %v1449_v34 }
 0x359   :  { %1612 = vst.msk [vmem:[#allocation3 + $0x18] sm:$0xff] %vm1608_vm5, %v1933_v9  ;;  %v1116_v60 = vpop.xlane.xlu0 %1115 }
 0x35a   :  { %1549 = vst.msk [vmem:[#allocation3 + $0x30] sm:$0xff] %vm1542_vm3, %v1516_v32  ;;  %v1517_v27 = vsub.f32 0.0, %v1116_v60  ;;  %v1369_v0 = vpop.xlane.xlu1 %1368 }
 0x35b   :  { %v1452_v48 = vmul.f32 0.0625, %v1369_v0 }
 0x35c   :  { %1550 = vst.msk [vmem:[#allocation3 + $0x38] sm:$0xff] %vm1542_vm3, %v1517_v27 }
 0x35d   :  { %1582 = vst.msk [vmem:[#allocation3 + $0x30] sm:$0xff] %vm1575_vm4, %v1452_v48  ;;  %v1372_v51 = vpop.xlane.xlu0 %1371 }
 0x35e   :  { %1615 = vst.msk [vmem:[#allocation3 + $0x30] sm:$0xff] %vm1608_vm5, %v1933_v9  ;;  %v1453_v57 = vmul.f32 0.0625, %v1372_v51  ;;  %v1107_v4 = vpop.xlane.xlu1 %1106 }
 0x35f   :  { %v1514_v54 = vsub.f32 0.0, %v1107_v4 }
 0x360   :  { %1583 = vst.msk [vmem:[#allocation3 + $0x38] sm:$0xff] %vm1575_vm4, %v1453_v57 }
 0x361   :  { %1616 = vst.msk [vmem:[#allocation3 + $0x38] sm:$0xff] %vm1608_vm5, %v1933_v9  ;;  %v1110_v33 = vpop.xlane.xlu0 %1109 }
 0x362   :  { %1547 = vst.msk [vmem:[#allocation3 + $0x20] sm:$0xff] %vm1542_vm3, %v1514_v54  ;;  %v1515_v43 = vsub.f32 0.0, %v1110_v33  ;;  %v1363_v28 = vpop.xlane.xlu1 %1362 }
 0x363   :  { %v1450_v26 = vmul.f32 0.0625, %v1363_v28 }
 0x364   :  { %1548 = vst.msk [vmem:[#allocation3 + $0x28] sm:$0xff] %vm1542_vm3, %v1515_v43 }
 0x365   :  { %1580 = vst.msk [vmem:[#allocation3 + $0x20] sm:$0xff] %vm1575_vm4, %v1450_v26  ;;  %v1366_v38 = vpop.xlane.xlu0 %1365 }
 0x366   :  { %1613 = vst.msk [vmem:[#allocation3 + $0x20] sm:$0xff] %vm1608_vm5, %v1933_v9  ;;  %v1451_v46 = vmul.f32 0.0625, %v1366_v38  ;;  %v1125_v45 = vpop.xlane.xlu1 %1124 }
 0x367   :  { %v1520_v24 = vsub.f32 0.0, %v1125_v45 }
 0x368   :  { %1581 = vst.msk [vmem:[#allocation3 + $0x28] sm:$0xff] %vm1575_vm4, %v1451_v46 }
 0x369   :  { %1614 = vst.msk [vmem:[#allocation3 + $0x28] sm:$0xff] %vm1608_vm5, %v1933_v9  ;;  %v1128_v13 = vpop.xlane.xlu0 %1127 }
 0x36a   :  { %1553 = vst.msk [vmem:[#allocation3 + $0x50] sm:$0xff] %vm1542_vm3, %v1520_v24  ;;  %v1521_v20 = vsub.f32 0.0, %v1128_v13  ;;  %v1381_v37 = vpop.xlane.xlu1 %1380 }
 0x36b   :  { %v1456_v41 = vmul.f32 0.0625, %v1381_v37 }
 0x36c   :  { %1554 = vst.msk [vmem:[#allocation3 + $0x58] sm:$0xff] %vm1542_vm3, %v1521_v20 }
 0x36d   :  { %1586 = vst.msk [vmem:[#allocation3 + $0x50] sm:$0xff] %vm1575_vm4, %v1456_v41  ;;  %v1384_v58 = vpop.xlane.xlu0 %1383 }
 0x36e   :  { %1619 = vst.msk [vmem:[#allocation3 + $0x50] sm:$0xff] %vm1608_vm5, %v1933_v9  ;;  %v1457_v18 = vmul.f32 0.0625, %v1384_v58  ;;  %v1119_v1 = vpop.xlane.xlu1 %1118 }
 0x36f   :  { %v1518_v8 = vsub.f32 0.0, %v1119_v1 }
 0x370   :  { %1587 = vst.msk [vmem:[#allocation3 + $0x58] sm:$0xff] %vm1575_vm4, %v1457_v18 }
 0x371   :  { %1620 = vst.msk [vmem:[#allocation3 + $0x58] sm:$0xff] %vm1608_vm5, %v1933_v9  ;;  %v1122_v17 = vpop.xlane.xlu0 %1121 }
 0x372   :  { %1551 = vst.msk [vmem:[#allocation3 + $0x40] sm:$0xff] %vm1542_vm3, %v1518_v8  ;;  %v1519_v30 = vsub.f32 0.0, %v1122_v17  ;;  %v1375_v5 = vpop.xlane.xlu1 %1374 }
 0x373   :  { %v1454_v42 = vmul.f32 0.0625, %v1375_v5 }
 0x374   :  { %1552 = vst.msk [vmem:[#allocation3 + $0x48] sm:$0xff] %vm1542_vm3, %v1519_v30 }
 0x375   :  { %1584 = vst.msk [vmem:[#allocation3 + $0x40] sm:$0xff] %vm1575_vm4, %v1454_v42  ;;  %v1378_v14 = vpop.xlane.xlu0 %1377 }
 0x376   :  { %1617 = vst.msk [vmem:[#allocation3 + $0x40] sm:$0xff] %vm1608_vm5, %v1933_v9  ;;  %v1455_v21 = vmul.f32 0.0625, %v1378_v14  ;;  %v1137_v35 = vpop.xlane.xlu1 %1136 }
 0x377   :  { %v1524_v55 = vsub.f32 0.0, %v1137_v35 }
 0x378   :  { %1585 = vst.msk [vmem:[#allocation3 + $0x48] sm:$0xff] %vm1575_vm4, %v1455_v21 }
 0x379   :  { %1618 = vst.msk [vmem:[#allocation3 + $0x48] sm:$0xff] %vm1608_vm5, %v1933_v9  ;;  %v1140_v31 = vpop.xlane.xlu0 %1139 }
 0x37a   :  { %1557 = vst.msk [vmem:[#allocation3 + $0x70] sm:$0xff] %vm1542_vm3, %v1524_v55  ;;  %v1525_v47 = vsub.f32 0.0, %v1140_v31  ;;  %v1393_v3 = vpop.xlane.xlu1 %1392 }
 0x37b   :  { %v1460_v59 = vmul.f32 0.0625, %v1393_v3 }
 0x37c   :  { %1558 = vst.msk [vmem:[#allocation3 + $0x78] sm:$0xff] %vm1542_vm3, %v1525_v47 }
 0x37d   :  { %1590 = vst.msk [vmem:[#allocation3 + $0x70] sm:$0xff] %vm1575_vm4, %v1460_v59  ;;  %v1396_v49 = vpop.xlane.xlu0 %1395 }
 0x37e   :  { %1623 = vst.msk [vmem:[#allocation3 + $0x70] sm:$0xff] %vm1608_vm5, %v1933_v9  ;;  %v1461_v10 = vmul.f32 0.0625, %v1396_v49  ;;  %v1131_v7 = vpop.xlane.xlu1 %1130 }
 0x37f   :  { %v1522_v15 = vsub.f32 0.0, %v1131_v7 }
 0x380   :  { %1591 = vst.msk [vmem:[#allocation3 + $0x78] sm:$0xff] %vm1575_vm4, %v1461_v10 }
 0x381   :  { %1624 = vst.msk [vmem:[#allocation3 + $0x78] sm:$0xff] %vm1608_vm5, %v1933_v9  ;;  %v1134_v22 = vpop.xlane.xlu0 %1133 }
 0x382   :  { %1555 = vst.msk [vmem:[#allocation3 + $0x60] sm:$0xff] %vm1542_vm3, %v1522_v15  ;;  %v1523_v56 = vsub.f32 0.0, %v1134_v22  ;;  %v1387_v19 = vpop.xlane.xlu1 %1386 }
 0x383   :  { %v1458_v23 = vmul.f32 0.0625, %v1387_v19 }
 0x384   :  { %1556 = vst.msk [vmem:[#allocation3 + $0x68] sm:$0xff] %vm1542_vm3, %v1523_v56 }
 0x385   :  { %1588 = vst.msk [vmem:[#allocation3 + $0x60] sm:$0xff] %vm1575_vm4, %v1458_v23  ;;  %v1390_v50 = vpop.xlane.xlu0 %1389 }
 0x386   :  { %1621 = vst.msk [vmem:[#allocation3 + $0x60] sm:$0xff] %vm1608_vm5, %v1933_v9  ;;  %v1459_v44 = vmul.f32 0.0625, %v1390_v50  ;;  %v1149_v52 = vpop.xlane.xlu1 %1148 }
 0x387   :  { %v1528_v2 = vsub.f32 0.0, %v1149_v52 }
 0x388   :  { %1589 = vst.msk [vmem:[#allocation3 + $0x68] sm:$0xff] %vm1575_vm4, %v1459_v44 }
 0x389   :  { %1622 = vst.msk [vmem:[#allocation3 + $0x68] sm:$0xff] %vm1608_vm5, %v1933_v9  ;;  %v1152_v61 = vpop.xlane.xlu0 %1151 }
 0x38a   :  { %1561 = vst.msk [vmem:[#allocation3 + $0x90] sm:$0xff] %vm1542_vm3, %v1528_v2  ;;  %v1529_v12 = vsub.f32 0.0, %v1152_v61  ;;  %v1405_v53 = vpop.xlane.xlu1 %1404 }
 0x38b   :  { %v1464_v29 = vmul.f32 0.0625, %v1405_v53 }
 0x38c   :  { %1562 = vst.msk [vmem:[#allocation3 + $0x98] sm:$0xff] %vm1542_vm3, %v1529_v12 }
 0x38d   :  { %1594 = vst.msk [vmem:[#allocation3 + $0x90] sm:$0xff] %vm1575_vm4, %v1464_v29  ;;  %v1408_v39 = vpop.xlane.xlu0 %1407 }
 0x38e   :  { %1627 = vst.msk [vmem:[#allocation3 + $0x90] sm:$0xff] %vm1608_vm5, %v1933_v9  ;;  %v1465_v40 = vmul.f32 0.0625, %v1408_v39  ;;  %v1143_v11 = vpop.xlane.xlu1 %1142 }
 0x38f   :  { %v1526_v16 = vsub.f32 0.0, %v1143_v11 }
 0x390   :  { %1595 = vst.msk [vmem:[#allocation3 + $0x98] sm:$0xff] %vm1575_vm4, %v1465_v40 }
 0x391   :  { %1628 = vst.msk [vmem:[#allocation3 + $0x98] sm:$0xff] %vm1608_vm5, %v1933_v9  ;;  %v1146_v62 = vpop.xlane.xlu0 %1145 }
 0x392   :  { %1559 = vst.msk [vmem:[#allocation3 + $0x80] sm:$0xff] %vm1542_vm3, %v1526_v16  ;;  %v1527_v25 = vsub.f32 0.0, %v1146_v62  ;;  %v1399_v6 = vpop.xlane.xlu1 %1398 }
 0x393   :  { %v1462_v36 = vmul.f32 0.0625, %v1399_v6 }
 0x394   :  { %1560 = vst.msk [vmem:[#allocation3 + $0x88] sm:$0xff] %vm1542_vm3, %v1527_v25 }
 0x395   :  { %1592 = vst.msk [vmem:[#allocation3 + $0x80] sm:$0xff] %vm1575_vm4, %v1462_v36  ;;  %v1402_v34 = vpop.xlane.xlu0 %1401 }
 0x396   :  { %1625 = vst.msk [vmem:[#allocation3 + $0x80] sm:$0xff] %vm1608_vm5, %v1933_v9  ;;  %v1463_v63 = vmul.f32 0.0625, %v1402_v34  ;;  %v1161_v32 = vpop.xlane.xlu1 %1160 }
 0x397   :  { %v1532_v60 = vsub.f32 0.0, %v1161_v32 }
 0x398   :  { %1593 = vst.msk [vmem:[#allocation3 + $0x88] sm:$0xff] %vm1575_vm4, %v1463_v63 }
 0x399   :  { %1626 = vst.msk [vmem:[#allocation3 + $0x88] sm:$0xff] %vm1608_vm5, %v1933_v9  ;;  %v1164_v27 = vpop.xlane.xlu0 %1163 }
 0x39a   :  { %1565 = vst.msk [vmem:[#allocation3 + $0xb0] sm:$0xff] %vm1542_vm3, %v1532_v60  ;;  %v1533_v0 = vsub.f32 0.0, %v1164_v27  ;;  %v1417_v48 = vpop.xlane.xlu1 %1416 }
 0x39b   :  { %v1468_v51 = vmul.f32 0.0625, %v1417_v48 }
 0x39c   :  { %1566 = vst.msk [vmem:[#allocation3 + $0xb8] sm:$0xff] %vm1542_vm3, %v1533_v0 }
 0x39d   :  { %1598 = vst.msk [vmem:[#allocation3 + $0xb0] sm:$0xff] %vm1575_vm4, %v1468_v51  ;;  %v1420_v57 = vpop.xlane.xlu0 %1419 }
 0x39e   :  { %1631 = vst.msk [vmem:[#allocation3 + $0xb0] sm:$0xff] %vm1608_vm5, %v1933_v9  ;;  %v1469_v4 = vmul.f32 0.0625, %v1420_v57  ;;  %v1155_v54 = vpop.xlane.xlu1 %1154 }
 0x39f   :  { %v1530_v33 = vsub.f32 0.0, %v1155_v54 }
 0x3a0   :  { %1599 = vst.msk [vmem:[#allocation3 + $0xb8] sm:$0xff] %vm1575_vm4, %v1469_v4 }
 0x3a1   :  { %1632 = vst.msk [vmem:[#allocation3 + $0xb8] sm:$0xff] %vm1608_vm5, %v1933_v9  ;;  %v1158_v43 = vpop.xlane.xlu0 %1157 }
 0x3a2   :  { %1563 = vst.msk [vmem:[#allocation3 + $0xa0] sm:$0xff] %vm1542_vm3, %v1530_v33  ;;  %v1531_v28 = vsub.f32 0.0, %v1158_v43  ;;  %v1411_v26 = vpop.xlane.xlu1 %1410 }
 0x3a3   :  { %v1466_v38 = vmul.f32 0.0625, %v1411_v26 }
 0x3a4   :  { %1564 = vst.msk [vmem:[#allocation3 + $0xa8] sm:$0xff] %vm1542_vm3, %v1531_v28 }
 0x3a5   :  { %1596 = vst.msk [vmem:[#allocation3 + $0xa0] sm:$0xff] %vm1575_vm4, %v1466_v38  ;;  %v1414_v46 = vpop.xlane.xlu0 %1413 }
 0x3a6   :  { %1629 = vst.msk [vmem:[#allocation3 + $0xa0] sm:$0xff] %vm1608_vm5, %v1933_v9  ;;  %v1467_v45 = vmul.f32 0.0625, %v1414_v46  ;;  %v1173_v24 = vpop.xlane.xlu1 %1172 }
 0x3a7   :  { %v1536_v13 = vsub.f32 0.0, %v1173_v24 }
 0x3a8   :  { %1597 = vst.msk [vmem:[#allocation3 + $0xa8] sm:$0xff] %vm1575_vm4, %v1467_v45 }
 0x3a9   :  { %1630 = vst.msk [vmem:[#allocation3 + $0xa8] sm:$0xff] %vm1608_vm5, %v1933_v9  ;;  %v1176_v20 = vpop.xlane.xlu0 %1175 }
 0x3aa   :  { %1569 = vst.msk [vmem:[#allocation3 + $0xd0] sm:$0xff] %vm1542_vm3, %v1536_v13  ;;  %v1537_v37 = vsub.f32 0.0, %v1176_v20  ;;  %v1429_v41 = vpop.xlane.xlu1 %1428 }
 0x3ab   :  { %v1472_v58 = vmul.f32 0.0625, %v1429_v41 }
 0x3ac   :  { %1570 = vst.msk [vmem:[#allocation3 + $0xd8] sm:$0xff] %vm1542_vm3, %v1537_v37 }
 0x3ad   :  { %1602 = vst.msk [vmem:[#allocation3 + $0xd0] sm:$0xff] %vm1575_vm4, %v1472_v58  ;;  %v1432_v18 = vpop.xlane.xlu0 %1431 }
 0x3ae   :  { %1635 = vst.msk [vmem:[#allocation3 + $0xd0] sm:$0xff] %vm1608_vm5, %v1933_v9  ;;  %v1473_v1 = vmul.f32 0.0625, %v1432_v18  ;;  %v1167_v8 = vpop.xlane.xlu1 %1166 }
 0x3af   :  { %v1534_v17 = vsub.f32 0.0, %v1167_v8 }
 0x3b0   :  { %1603 = vst.msk [vmem:[#allocation3 + $0xd8] sm:$0xff] %vm1575_vm4, %v1473_v1 }
 0x3b1   :  { %1636 = vst.msk [vmem:[#allocation3 + $0xd8] sm:$0xff] %vm1608_vm5, %v1933_v9  ;;  %v1170_v30 = vpop.xlane.xlu0 %1169 }
 0x3b2   :  { %1567 = vst.msk [vmem:[#allocation3 + $0xc0] sm:$0xff] %vm1542_vm3, %v1534_v17  ;;  %v1535_v5 = vsub.f32 0.0, %v1170_v30  ;;  %v1423_v42 = vpop.xlane.xlu1 %1422 }
 0x3b3   :  { %v1470_v14 = vmul.f32 0.0625, %v1423_v42 }
 0x3b4   :  { %1568 = vst.msk [vmem:[#allocation3 + $0xc8] sm:$0xff] %vm1542_vm3, %v1535_v5 }
 0x3b5   :  { %1600 = vst.msk [vmem:[#allocation3 + $0xc0] sm:$0xff] %vm1575_vm4, %v1470_v14  ;;  %v1426_v21 = vpop.xlane.xlu0 %1425 }
 0x3b6   :  { %1633 = vst.msk [vmem:[#allocation3 + $0xc0] sm:$0xff] %vm1608_vm5, %v1933_v9  ;;  %v1471_v35 = vmul.f32 0.0625, %v1426_v21  ;;  %v1185_v55 = vpop.xlane.xlu1 %1184 }
 0x3b7   :  { %v1540_v31 = vsub.f32 0.0, %v1185_v55 }
 0x3b8   :  { %1601 = vst.msk [vmem:[#allocation3 + $0xc8] sm:$0xff] %vm1575_vm4, %v1471_v35 }
 0x3b9   :  { %1634 = vst.msk [vmem:[#allocation3 + $0xc8] sm:$0xff] %vm1608_vm5, %v1933_v9  ;;  %v1188_v47 = vpop.xlane.xlu0 %1187 }
 0x3ba   :  { %1573 = vst.msk [vmem:[#allocation3 + $0xf0] sm:$0xff] %vm1542_vm3, %v1540_v31  ;;  %v1541_v3 = vsub.f32 0.0, %v1188_v47  ;;  %v1179_v59 = vpop.xlane.xlu1 %1178 }
 0x3bb   :  { %v1538_v49 = vsub.f32 0.0, %v1179_v59 }
 0x3bc   :  { %1574 = vst.msk [vmem:[#allocation3 + $0xf8] sm:$0xff] %vm1542_vm3, %v1541_v3 }
 0x3bd   :  { %1571 = vst.msk [vmem:[#allocation3 + $0xe0] sm:$0xff] %vm1542_vm3, %v1538_v49  ;;  %v1182_v10 = vpop.xlane.xlu0 %1181 }
 0x3be   :  { %v1539_v7 = vsub.f32 0.0, %v1182_v10  ;;  %v1435_v15 = vpop.xlane.xlu1 %1434 }
 0x3bf   :  { %v1474_v22 = vmul.f32 0.0625, %v1435_v15 }
 0x3c0   :  { %1572 = vst.msk [vmem:[#allocation3 + $0xe8] sm:$0xff] %vm1542_vm3, %v1539_v7 }
 0x3c1   :  { %1604 = vst.msk [vmem:[#allocation3 + $0xe0] sm:$0xff] %vm1575_vm4, %v1474_v22  ;;  %v1438_v56 = vpop.xlane.xlu0 %1437 }
 0x3c2   :  { %1637 = vst.msk [vmem:[#allocation3 + $0xe0] sm:$0xff] %vm1608_vm5, %v1933_v9  ;;  %v1475_v19 = vmul.f32 0.0625, %v1438_v56  ;;  %v1441_v23 = vpop.xlane.xlu1 %1440 }
 0x3c3   :  { %v1476_v50 = vmul.f32 0.0625, %v1441_v23 }
 0x3c4   :  { %1605 = vst.msk [vmem:[#allocation3 + $0xe8] sm:$0xff] %vm1575_vm4, %v1475_v19 }
 0x3c5   :  { %1638 = vst.msk [vmem:[#allocation3 + $0xe8] sm:$0xff] %vm1608_vm5, %v1933_v9  ;;  %v1444_v44 = vpop.xlane.xlu0 %1443 }
 0x3c6   :  { %1606 = vst.msk [vmem:[#allocation3 + $0xf0] sm:$0xff] %vm1575_vm4, %v1476_v50  ;;  %v1477_v52 = vmul.f32 0.0625, %v1444_v44 }
 0x3c7   :  { %1639 = vst.msk [vmem:[#allocation3 + $0xf0] sm:$0xff] %vm1608_vm5, %v1933_v9 }
 0x3c8   :  { %1607 = vst.msk [vmem:[#allocation3 + $0xf8] sm:$0xff] %vm1575_vm4, %v1477_v52 }
 0x3c9   :  { %1640 = vst.msk [vmem:[#allocation3 + $0xf8] sm:$0xff] %vm1608_vm5, %v1933_v9 }
 0x3ca   :  { %1920 = shalt.err (!%p1917_p4)
}
 0x3cb   :  { %s1935_s0 = smov 128   ;;  %s1936_s4 = smov 8  }
 0x3cc   :  { %1652 = dma.vmem_to_hbm [thread:$0]  %s1647_s10, 4096, %s3072_s7, [#allocation4], %s1935_s0, %s1935_s0, %s1936_s4  }
 0x3cd   :  { %1929 = dma.done.wait [#allocation4], 4096  }
 0x3ce   :  { %1930 = vsyncadd [#allocation4], 4294963200 }
 0x3cf   :  { %1656 = vsyncpa [#allocation4], 1 }

</bundles_post_ra>
